<compile_context>
chip_gen: v6e
topology: v6e:2x2x1
jax: 0.10.0
libtpu: 0.0.40
codegen_flags: <defaults>
</compile_context>

<pallas_src>
import functools

import jax
import jax.numpy as jnp
from jax.experimental import pallas as pl
from jax.experimental.pallas import tpu as pltpu


def _round_up(x, m):
    return ((x + m - 1) // m) * m


# ----------------------------------------------------------------------------
# Fused decoder kernel: all layers + output projection.
# Prepared gate order: i, f, o, g.   gates = x @ W_ih^T + h @ W_hh^T + b
# ----------------------------------------------------------------------------
def _make_decoder_kernel(num_layers, T, B_blk, E, H, Vp):
    del Vp  # carried by the output ref shape

    def kernel(x_ref, h0_ref, c0_ref, *rest):
        idx = 0
        layer_refs = []
        for _ in range(num_layers):                 # (in,4H), (H,4H), (1,4H)
            layer_refs.append((rest[idx], rest[idx + 1], rest[idx + 2]))
            idx += 3
        h2oT_ref = rest[idx]; idx += 1              # (H, Vp)
        h2ob_ref = rest[idx]; idx += 1              # (1, Vp)
        o_ref = rest[idx]; idx += 1                 # (T, B_blk, Vp)
        hN_ref = rest[idx]; idx += 1                # (L, B_blk, H)
        cN_ref = rest[idx]; idx += 1                # (L, B_blk, H)

        # Flatten (T, Bb, E) -> (T*Bb, E) once; activations stay traced (vregs)
        # for the whole kernel -- no per-step masked VMEM traffic.
        x = x_ref[...].reshape(T * B_blk, E)

        for layer in range(num_layers):
            wihT_ref, whhT_ref, b_ref = layer_refs[layer]
            mx_dt = wihT_ref.dtype

            # Hoisted input projection + fused bias: one bulk MXU matmul over
            # all T*Bb rows, off the serial critical path. f32 accumulation.
            gx = (jnp.dot(x.astype(mx_dt), wihT_ref[...],
                          preferred_element_type=jnp.float32)
                  + b_ref[...])

            whhT = whhT_ref[...]                    # load once, reuse each step
            h = h0_ref[layer]
            c = c0_ref[layer]
            ys = []
            # TODO(synk): for T >~ 64 switch to lax.fori_loop(..., unroll=4..8)
            # with (h, c) carries instead of full static unroll (vreg spills).
            # TODO(synk): hold whhT in the MXU weight registers across the loop
            # (pltpu.matmul_push_rhs / matmul_acc_lhs / matmul_pop) to avoid
            # re-pushing the loop-invariant RHS every step.
            for t in range(T):
                gates = (gx[t * B_blk:(t + 1) * B_blk, :]
                         + jnp.dot(h.astype(mx_dt), whhT,
                                   preferred_element_type=jnp.float32))
                # Reordered layout [i | f | o | g]: 1 sigmoid + 1 tanh push.
                sig = jax.nn.sigmoid(gates[:, :3 * H])
                g = jnp.tanh(gates[:, 3 * H:])
                c = sig[:, H:2 * H] * c + sig[:, :H] * g
                h = sig[:, 2 * H:3 * H] * jnp.tanh(c)
                ys.append(h)
            # Final states written once per layer (not per step).
            hN_ref[layer] = h
            cN_ref[layer] = c
            x = jnp.concatenate(ys, axis=0)         # (T*Bb, H), stays traced

        # Fused h2o projection over all rows; lane-dense (Vp % 128 == 0) store.
        out = (jnp.dot(x.astype(h2oT_ref.dtype), h2oT_ref[...],
                       preferred_element_type=jnp.float32)
               + h2ob_ref[...])
        o_ref[...] = out.reshape(o_ref.shape)

    return kernel


# ----------------------------------------------------------------------------
# Parameter preparation (once): transpose, gate reorder, bias fusion, V-pad.
# ----------------------------------------------------------------------------
def _reorder_gates(w):
    # PyTorch packs LSTM gates as [i, f, g, o] along the leading 4H axis.
    # Reorder to [i, f, o, g] so the kernel applies one sigmoid to the first
    # 3H columns and one tanh to the last H columns.
    i, f, g, o = jnp.split(w, 4, axis=0)
    return jnp.concatenate([i, f, o, g], axis=0)


def prepare_params(raw, compute_dtype=jnp.float32):
    # compute_dtype: dtype of MXU weight operands. Keep f32 on v5e (no bf16
    # VPU/EUP anyway; gate math stays f32 regardless). Use jnp.bfloat16 on
    # v6e/v7x for ~2x MXU throughput and half the weight bytes.
    V, H = raw["h2o_w"].shape
    Vp = _round_up(V, 128)          # lane-dense logits: unmasked 128-lane vst

    h2o_wT = jnp.transpose(raw["h2o_w"]).astype(compute_dtype)      # (H, V)
    h2o_wT = jnp.pad(h2o_wT, ((0, 0), (0, Vp - V)))                 # zero cols
    h2o_b = jnp.pad(raw["h2o_b"].astype(jnp.float32),
                    (0, Vp - V)).reshape(1, Vp)

    prepped = {
        "embed": raw["embed"].astype(jnp.float32),
        "h2o_wT": h2o_wT,
        "h2o_b": h2o_b,
        "lstm": [],
    }
    for (w_ih, w_hh, b_ih, b_hh) in raw["lstm"]:
        prepped["lstm"].append((
            jnp.transpose(_reorder_gates(w_ih)).astype(compute_dtype),  # (in,4H)
            jnp.transpose(_reorder_gates(w_hh)).astype(compute_dtype),  # (H, 4H)
            _reorder_gates(b_ih + b_hh).reshape(1, -1).astype(jnp.float32),
        ))
    return prepped


# ----------------------------------------------------------------------------
# Decoder forward (matches the PyTorch module's eval-mode forward).
# ----------------------------------------------------------------------------
@functools.partial(jax.jit, static_argnames=("num_batch_blocks",))
def decoder_forward(prepped, x, h0, c0, num_batch_blocks=1):
    # x: (T, B) int32 token ids
    T, B = x.shape
    embed = prepped["embed"]
    V, E = embed.shape
    H = h0.shape[-1]
    Vp = prepped["h2o_wT"].shape[1]
    L = len(prepped["lstm"])

    nb = num_batch_blocks
    assert B % nb == 0
    Bb = B // nb

    # TODO(synk): fuse the embedding gather into the kernel (scalar-prefetch
    # token ids + per-row DMA gather) for production T*B*E; trivial here.
    embed_x = jnp.take(embed, x, axis=0)            # (T, B, E)

    flat_w = []
    for (wihT, whhT, bias) in prepped["lstm"]:
        flat_w += [wihT, whhT, bias]
    const_args = flat_w + [prepped["h2o_wT"], prepped["h2o_b"]]

    in_specs = [
        pl.BlockSpec((T, Bb, E), lambda b: (0, b, 0)),
        pl.BlockSpec((L, Bb, H), lambda b: (0, b, 0)),
        pl.BlockSpec((L, Bb, H), lambda b: (0, b, 0)),
    ]
    for w in const_args:
        in_specs.append(pl.BlockSpec(w.shape, lambda b: (0, 0)))

    out_specs = (
        pl.BlockSpec((T, Bb, Vp), lambda b: (0, b, 0)),
        pl.BlockSpec((L, Bb, H), lambda b: (0, b, 0)),
        pl.BlockSpec((L, Bb, H), lambda b: (0, b, 0)),
    )

    kernel = _make_decoder_kernel(L, T, Bb, E, H, Vp)
    out3, h_n, c_n = pl.pallas_call(
        kernel,
        out_shape=(
            jax.ShapeDtypeStruct((T, B, Vp), jnp.float32),
            jax.ShapeDtypeStruct((L, B, H), jnp.float32),
            jax.ShapeDtypeStruct((L, B, H), jnp.float32),
        ),
        grid_spec=pltpu.PrefetchScalarGridSpec(
            num_scalar_prefetch=0,
            grid=(nb,),
            in_specs=in_specs,
            out_specs=out_specs,
        ),
        compiler_params=pltpu.CompilerParams(
            dimension_semantics=("parallel",)),
    )(embed_x, h0, c0, *const_args)

    # TODO(synk): nn.LSTM inter-layer dropout is train-only; eval forward skips it.
    # Slice off the zero-padded vocab lanes.
    return out3[:, :, :V], (h_n, c_n)


# ----------------------------------------------------------------------------
# Pure-JAX reference (original PyTorch gate order) for correctness check.
# ----------------------------------------------------------------------------
def reference_forward(params, x, h0, c0):
    embed_x = params["embed"][x]
    inp = embed_x
    hs, cs = [], []
    for layer in range(len(params["lstm"])):
        w_ih, w_hh, b_ih, b_hh = params["lstm"][layer]
        H = w_hh.shape[1]
        h, c = h0[layer], c0[layer]
        ys = []
        for t in range(inp.shape[0]):
            gates = inp[t] @ w_ih.T + h @ w_hh.T + b_ih + b_hh
            i = jax.nn.sigmoid(gates[:, 0 * H:1 * H])
            f = jax.nn.sigmoid(gates[:, 1 * H:2 * H])
            g = jnp.tanh(gates[:, 2 * H:3 * H])
            o = jax.nn.sigmoid(gates[:, 3 * H:4 * H])
            c = f * c + i * g
            h = o * jnp.tanh(c)
            ys.append(h)
        inp = jnp.stack(ys, axis=0)
        hs.append(h)
        cs.append(c)
    out = inp @ params["h2o_w"].T + params["h2o_b"]
    return out, (jnp.stack(hs), jnp.stack(cs))


if __name__ == "__main__":
    # Small shapes implied by the module's __init__ options.
    NUM_EMBEDDINGS = 32   # vocab size
    EMBED_SIZE = 32
    HIDDEN_SIZE = 32
    NUM_LAYERS = 2
    T, B = 8, 2

    key = jax.random.PRNGKey(0)
    keys = jax.random.split(key, 4 + 4 * NUM_LAYERS)

    scale = 0.1
    params = {
        "embed": scale * jax.random.normal(
            keys[0], (NUM_EMBEDDINGS, EMBED_SIZE), jnp.float32),
        "h2o_w": scale * jax.random.normal(
            keys[1], (NUM_EMBEDDINGS, HIDDEN_SIZE), jnp.float32),
        "h2o_b": scale * jax.random.normal(
            keys[2], (NUM_EMBEDDINGS,), jnp.float32),
        "lstm": [],
    }
    for layer in range(NUM_LAYERS):
        in_sz = EMBED_SIZE if layer == 0 else HIDDEN_SIZE
        k = keys[4 + 4 * layer: 4 + 4 * (layer + 1)]
        params["lstm"].append((
            scale * jax.random.normal(k[0], (4 * HIDDEN_SIZE, in_sz), jnp.float32),
            scale * jax.random.normal(k[1], (4 * HIDDEN_SIZE, HIDDEN_SIZE), jnp.float32),
            scale * jax.random.normal(k[2], (4 * HIDDEN_SIZE,), jnp.float32),
            scale * jax.random.normal(k[3], (4 * HIDDEN_SIZE,), jnp.float32),
        ))

    x = jax.random.randint(keys[3], (T, B), 0, NUM_EMBEDDINGS, dtype=jnp.int32)
    # hidden=None in the PyTorch forward -> zero initial states.
    h0 = jnp.zeros((NUM_LAYERS, B, HIDDEN_SIZE), jnp.float32)
    c0 = jnp.zeros((NUM_LAYERS, B, HIDDEN_SIZE), jnp.float32)

    # One-time weight transpose / gate reorder / bias fusion / vocab padding.
    # (On v6e/v7x pass compute_dtype=jnp.bfloat16 here; on v7x also pass
    # num_batch_blocks=2 below to use both TensorCores.)
    prepped = prepare_params(params, compute_dtype=jnp.float32)

    out, (h_n, c_n) = decoder_forward(prepped, x, h0, c0, num_batch_blocks=1)
    jax.block_until_ready((out, h_n, c_n))

    ref_out, (ref_h, ref_c) = reference_forward(params, x, h0, c0)
    assert out.shape == (T, B, NUM_EMBEDDINGS)
    assert h_n.shape == (NUM_LAYERS, B, HIDDEN_SIZE)
    assert c_n.shape == (NUM_LAYERS, B, HIDDEN_SIZE)
    assert jnp.allclose(out, ref_out, atol=1e-3, rtol=1e-3)
    assert jnp.allclose(h_n, ref_h, atol=1e-3, rtol=1e-3)
    assert jnp.allclose(c_n, ref_c, atol=1e-3, rtol=1e-3)

    print("KERNEL_OK")
</pallas_src>

<mosaic_0001>
module attributes {stable_mosaic.version = 11 : i64} {
  func.func @kernel(%arg0: i32, %arg1: memref<8x2x32xf32, #tpu.memory_space<vmem>>, %arg2: memref<2x2x32xf32, #tpu.memory_space<vmem>>, %arg3: memref<2x2x32xf32, #tpu.memory_space<vmem>>, %arg4: memref<32x128xf32, #tpu.memory_space<vmem>>, %arg5: memref<32x128xf32, #tpu.memory_space<vmem>>, %arg6: memref<1x128xf32, #tpu.memory_space<vmem>>, %arg7: memref<32x128xf32, #tpu.memory_space<vmem>>, %arg8: memref<32x128xf32, #tpu.memory_space<vmem>>, %arg9: memref<1x128xf32, #tpu.memory_space<vmem>>, %arg10: memref<32x128xf32, #tpu.memory_space<vmem>>, %arg11: memref<1x128xf32, #tpu.memory_space<vmem>>, %arg12: memref<8x2x128xf32, #tpu.memory_space<vmem>>, %arg13: memref<2x2x32xf32, #tpu.memory_space<vmem>>, %arg14: memref<2x2x32xf32, #tpu.memory_space<vmem>>) attributes {dimension_semantics = [#tpu.dimension_semantics<parallel>], iteration_bounds = array<i64: 1>, scalar_prefetch = 0 : i64, scratch_operands = 0 : i64, tpu.core_type = #tpu.core_type<tc>, window_params = [{transform_indices = @transform_0, window_bounds = array<i64: 8, 2, 32>}, {transform_indices = @transform_1, window_bounds = array<i64: 2, 2, 32>}, {transform_indices = @transform_2, window_bounds = array<i64: 2, 2, 32>}, {pipeline_mode = #tpu.pipeline_mode<synchronous>, transform_indices = @transform_3, window_bounds = array<i64: 32, 128>}, {pipeline_mode = #tpu.pipeline_mode<synchronous>, transform_indices = @transform_4, window_bounds = array<i64: 32, 128>}, {pipeline_mode = #tpu.pipeline_mode<synchronous>, transform_indices = @transform_5, window_bounds = array<i64: 1, 128>}, {pipeline_mode = #tpu.pipeline_mode<synchronous>, transform_indices = @transform_6, window_bounds = array<i64: 32, 128>}, {pipeline_mode = #tpu.pipeline_mode<synchronous>, transform_indices = @transform_7, window_bounds = array<i64: 32, 128>}, {pipeline_mode = #tpu.pipeline_mode<synchronous>, transform_indices = @transform_8, window_bounds = array<i64: 1, 128>}, {pipeline_mode = #tpu.pipeline_mode<synchronous>, transform_indices = @transform_9, window_bounds = array<i64: 32, 128>}, {pipeline_mode = #tpu.pipeline_mode<synchronous>, transform_indices = @transform_10, window_bounds = array<i64: 1, 128>}, {transform_indices = @transform_11, window_bounds = array<i64: 8, 2, 128>}, {transform_indices = @transform_12, window_bounds = array<i64: 2, 2, 32>}, {transform_indices = @transform_13, window_bounds = array<i64: 2, 2, 32>}]} {
    %c0 = arith.constant 0 : index
    %c0_0 = arith.constant 0 : index
    %c0_1 = arith.constant 0 : index
    %0 = vector.load %arg1[%c0, %c0_0, %c0_1] : memref<8x2x32xf32, #tpu.memory_space<vmem>>, vector<8x2x32xf32>
    %1 = vector.shape_cast %0 : vector<8x2x32xf32> to vector<16x32xf32>
    %c0_2 = arith.constant 0 : index
    %c0_3 = arith.constant 0 : index
    %2 = vector.load %arg4[%c0_2, %c0_3] : memref<32x128xf32, #tpu.memory_space<vmem>>, vector<32x128xf32>
    %cst = arith.constant dense<0.000000e+00> : vector<16x128xf32>
    %3 = tpu.matmul %1, %2, %cst {dimension_numbers = #tpu.dot_dimension_numbers<[1], [0], [0], [1], [0, 0, 1, 1], [], []>} : vector<16x32xf32>, vector<32x128xf32>, vector<16x128xf32> -> vector<16x128xf32>
    %c0_4 = arith.constant 0 : index
    %c0_5 = arith.constant 0 : index
    %4 = vector.load %arg6[%c0_4, %c0_5] : memref<1x128xf32, #tpu.memory_space<vmem>>, vector<1x128xf32>
    %5 = vector.broadcast %4 : vector<1x128xf32> to vector<16x128xf32>
    %6 = arith.addf %3, %5 : vector<16x128xf32>
    %c0_6 = arith.constant 0 : index
    %c0_7 = arith.constant 0 : index
    %7 = vector.load %arg5[%c0_6, %c0_7] : memref<32x128xf32, #tpu.memory_space<vmem>>, vector<32x128xf32>
    %c0_8 = arith.constant 0 : index
    %c0_9 = arith.constant 0 : index
    %c0_10 = arith.constant 0 : index
    %8 = vector.load %arg2[%c0_8, %c0_9, %c0_10] : memref<2x2x32xf32, #tpu.memory_space<vmem>>, vector<1x2x32xf32>
    %9 = vector.shape_cast %8 : vector<1x2x32xf32> to vector<2x32xf32>
    %c0_11 = arith.constant 0 : index
    %c0_12 = arith.constant 0 : index
    %c0_13 = arith.constant 0 : index
    %10 = vector.load %arg3[%c0_11, %c0_12, %c0_13] : memref<2x2x32xf32, #tpu.memory_space<vmem>>, vector<1x2x32xf32>
    %11 = vector.shape_cast %10 : vector<1x2x32xf32> to vector<2x32xf32>
    %12 = vector.extract_strided_slice %6 {offsets = [0, 0], sizes = [2, 128], strides = [1, 1]} : vector<16x128xf32> to vector<2x128xf32>
    %cst_14 = arith.constant dense<0.000000e+00> : vector<2x128xf32>
    %13 = tpu.matmul %9, %7, %cst_14 {dimension_numbers = #tpu.dot_dimension_numbers<[1], [0], [0], [1], [0, 0, 1, 1], [], []>} : vector<2x32xf32>, vector<32x128xf32>, vector<2x128xf32> -> vector<2x128xf32>
    %14 = arith.addf %12, %13 : vector<2x128xf32>
    %15 = vector.extract_strided_slice %14 {offsets = [0, 0], sizes = [2, 96], strides = [1, 1]} : vector<2x128xf32> to vector<2x96xf32>
    %16 = arith.negf %15 : vector<2x96xf32>
    %17 = math.exp %16 : vector<2x96xf32>
    %cst_15 = arith.constant 1.000000e+00 : f32
    %18 = vector.broadcast %cst_15 : f32 to vector<2x96xf32>
    %19 = arith.addf %18, %17 : vector<2x96xf32>
    %20 = arith.divf %18, %19 : vector<2x96xf32>
    %21 = vector.extract_strided_slice %14 {offsets = [0, 96], sizes = [2, 32], strides = [1, 1]} : vector<2x128xf32> to vector<2x32xf32>
    %22 = math.tanh %21 : vector<2x32xf32>
    %23 = vector.extract_strided_slice %20 {offsets = [0, 32], sizes = [2, 32], strides = [1, 1]} : vector<2x96xf32> to vector<2x32xf32>
    %24 = arith.mulf %23, %11 : vector<2x32xf32>
    %25 = vector.extract_strided_slice %20 {offsets = [0, 0], sizes = [2, 32], strides = [1, 1]} : vector<2x96xf32> to vector<2x32xf32>
    %26 = arith.mulf %25, %22 : vector<2x32xf32>
    %27 = arith.addf %24, %26 : vector<2x32xf32>
    %28 = vector.extract_strided_slice %20 {offsets = [0, 64], sizes = [2, 32], strides = [1, 1]} : vector<2x96xf32> to vector<2x32xf32>
    %29 = math.tanh %27 : vector<2x32xf32>
    %30 = arith.mulf %28, %29 : vector<2x32xf32>
    %31 = vector.extract_strided_slice %6 {offsets = [2, 0], sizes = [2, 128], strides = [1, 1]} : vector<16x128xf32> to vector<2x128xf32>
    %cst_16 = arith.constant dense<0.000000e+00> : vector<2x128xf32>
    %32 = tpu.matmul %30, %7, %cst_16 {dimension_numbers = #tpu.dot_dimension_numbers<[1], [0], [0], [1], [0, 0, 1, 1], [], []>} : vector<2x32xf32>, vector<32x128xf32>, vector<2x128xf32> -> vector<2x128xf32>
    %33 = arith.addf %31, %32 : vector<2x128xf32>
    %34 = vector.extract_strided_slice %33 {offsets = [0, 0], sizes = [2, 96], strides = [1, 1]} : vector<2x128xf32> to vector<2x96xf32>
    %35 = arith.negf %34 : vector<2x96xf32>
    %36 = math.exp %35 : vector<2x96xf32>
    %cst_17 = arith.constant 1.000000e+00 : f32
    %37 = vector.broadcast %cst_17 : f32 to vector<2x96xf32>
    %38 = arith.addf %37, %36 : vector<2x96xf32>
    %39 = arith.divf %37, %38 : vector<2x96xf32>
    %40 = vector.extract_strided_slice %33 {offsets = [0, 96], sizes = [2, 32], strides = [1, 1]} : vector<2x128xf32> to vector<2x32xf32>
    %41 = math.tanh %40 : vector<2x32xf32>
    %42 = vector.extract_strided_slice %39 {offsets = [0, 32], sizes = [2, 32], strides = [1, 1]} : vector<2x96xf32> to vector<2x32xf32>
    %43 = arith.mulf %42, %27 : vector<2x32xf32>
    %44 = vector.extract_strided_slice %39 {offsets = [0, 0], sizes = [2, 32], strides = [1, 1]} : vector<2x96xf32> to vector<2x32xf32>
    %45 = arith.mulf %44, %41 : vector<2x32xf32>
    %46 = arith.addf %43, %45 : vector<2x32xf32>
    %47 = vector.extract_strided_slice %39 {offsets = [0, 64], sizes = [2, 32], strides = [1, 1]} : vector<2x96xf32> to vector<2x32xf32>
    %48 = math.tanh %46 : vector<2x32xf32>
    %49 = arith.mulf %47, %48 : vector<2x32xf32>
    %50 = vector.extract_strided_slice %6 {offsets = [4, 0], sizes = [2, 128], strides = [1, 1]} : vector<16x128xf32> to vector<2x128xf32>
    %cst_18 = arith.constant dense<0.000000e+00> : vector<2x128xf32>
    %51 = tpu.matmul %49, %7, %cst_18 {dimension_numbers = #tpu.dot_dimension_numbers<[1], [0], [0], [1], [0, 0, 1, 1], [], []>} : vector<2x32xf32>, vector<32x128xf32>, vector<2x128xf32> -> vector<2x128xf32>
    %52 = arith.addf %50, %51 : vector<2x128xf32>
    %53 = vector.extract_strided_slice %52 {offsets = [0, 0], sizes = [2, 96], strides = [1, 1]} : vector<2x128xf32> to vector<2x96xf32>
    %54 = arith.negf %53 : vector<2x96xf32>
    %55 = math.exp %54 : vector<2x96xf32>
    %cst_19 = arith.constant 1.000000e+00 : f32
    %56 = vector.broadcast %cst_19 : f32 to vector<2x96xf32>
    %57 = arith.addf %56, %55 : vector<2x96xf32>
    %58 = arith.divf %56, %57 : vector<2x96xf32>
    %59 = vector.extract_strided_slice %52 {offsets = [0, 96], sizes = [2, 32], strides = [1, 1]} : vector<2x128xf32> to vector<2x32xf32>
    %60 = math.tanh %59 : vector<2x32xf32>
    %61 = vector.extract_strided_slice %58 {offsets = [0, 32], sizes = [2, 32], strides = [1, 1]} : vector<2x96xf32> to vector<2x32xf32>
    %62 = arith.mulf %61, %46 : vector<2x32xf32>
    %63 = vector.extract_strided_slice %58 {offsets = [0, 0], sizes = [2, 32], strides = [1, 1]} : vector<2x96xf32> to vector<2x32xf32>
    %64 = arith.mulf %63, %60 : vector<2x32xf32>
    %65 = arith.addf %62, %64 : vector<2x32xf32>
    %66 = vector.extract_strided_slice %58 {offsets = [0, 64], sizes = [2, 32], strides = [1, 1]} : vector<2x96xf32> to vector<2x32xf32>
    %67 = math.tanh %65 : vector<2x32xf32>
    %68 = arith.mulf %66, %67 : vector<2x32xf32>
    %69 = vector.extract_strided_slice %6 {offsets = [6, 0], sizes = [2, 128], strides = [1, 1]} : vector<16x128xf32> to vector<2x128xf32>
    %cst_20 = arith.constant dense<0.000000e+00> : vector<2x128xf32>
    %70 = tpu.matmul %68, %7, %cst_20 {dimension_numbers = #tpu.dot_dimension_numbers<[1], [0], [0], [1], [0, 0, 1, 1], [], []>} : vector<2x32xf32>, vector<32x128xf32>, vector<2x128xf32> -> vector<2x128xf32>
    %71 = arith.addf %69, %70 : vector<2x128xf32>
    %72 = vector.extract_strided_slice %71 {offsets = [0, 0], sizes = [2, 96], strides = [1, 1]} : vector<2x128xf32> to vector<2x96xf32>
    %73 = arith.negf %72 : vector<2x96xf32>
    %74 = math.exp %73 : vector<2x96xf32>
    %cst_21 = arith.constant 1.000000e+00 : f32
    %75 = vector.broadcast %cst_21 : f32 to vector<2x96xf32>
    %76 = arith.addf %75, %74 : vector<2x96xf32>
    %77 = arith.divf %75, %76 : vector<2x96xf32>
    %78 = vector.extract_strided_slice %71 {offsets = [0, 96], sizes = [2, 32], strides = [1, 1]} : vector<2x128xf32> to vector<2x32xf32>
    %79 = math.tanh %78 : vector<2x32xf32>
    %80 = vector.extract_strided_slice %77 {offsets = [0, 32], sizes = [2, 32], strides = [1, 1]} : vector<2x96xf32> to vector<2x32xf32>
    %81 = arith.mulf %80, %65 : vector<2x32xf32>
    %82 = vector.extract_strided_slice %77 {offsets = [0, 0], sizes = [2, 32], strides = [1, 1]} : vector<2x96xf32> to vector<2x32xf32>
    %83 = arith.mulf %82, %79 : vector<2x32xf32>
    %84 = arith.addf %81, %83 : vector<2x32xf32>
    %85 = vector.extract_strided_slice %77 {offsets = [0, 64], sizes = [2, 32], strides = [1, 1]} : vector<2x96xf32> to vector<2x32xf32>
    %86 = math.tanh %84 : vector<2x32xf32>
    %87 = arith.mulf %85, %86 : vector<2x32xf32>
    %88 = vector.extract_strided_slice %6 {offsets = [8, 0], sizes = [2, 128], strides = [1, 1]} : vector<16x128xf32> to vector<2x128xf32>
    %cst_22 = arith.constant dense<0.000000e+00> : vector<2x128xf32>
    %89 = tpu.matmul %87, %7, %cst_22 {dimension_numbers = #tpu.dot_dimension_numbers<[1], [0], [0], [1], [0, 0, 1, 1], [], []>} : vector<2x32xf32>, vector<32x128xf32>, vector<2x128xf32> -> vector<2x128xf32>
    %90 = arith.addf %88, %89 : vector<2x128xf32>
    %91 = vector.extract_strided_slice %90 {offsets = [0, 0], sizes = [2, 96], strides = [1, 1]} : vector<2x128xf32> to vector<2x96xf32>
    %92 = arith.negf %91 : vector<2x96xf32>
    %93 = math.exp %92 : vector<2x96xf32>
    %cst_23 = arith.constant 1.000000e+00 : f32
    %94 = vector.broadcast %cst_23 : f32 to vector<2x96xf32>
    %95 = arith.addf %94, %93 : vector<2x96xf32>
    %96 = arith.divf %94, %95 : vector<2x96xf32>
    %97 = vector.extract_strided_slice %90 {offsets = [0, 96], sizes = [2, 32], strides = [1, 1]} : vector<2x128xf32> to vector<2x32xf32>
    %98 = math.tanh %97 : vector<2x32xf32>
    %99 = vector.extract_strided_slice %96 {offsets = [0, 32], sizes = [2, 32], strides = [1, 1]} : vector<2x96xf32> to vector<2x32xf32>
    %100 = arith.mulf %99, %84 : vector<2x32xf32>
    %101 = vector.extract_strided_slice %96 {offsets = [0, 0], sizes = [2, 32], strides = [1, 1]} : vector<2x96xf32> to vector<2x32xf32>
    %102 = arith.mulf %101, %98 : vector<2x32xf32>
    %103 = arith.addf %100, %102 : vector<2x32xf32>
    %104 = vector.extract_strided_slice %96 {offsets = [0, 64], sizes = [2, 32], strides = [1, 1]} : vector<2x96xf32> to vector<2x32xf32>
    %105 = math.tanh %103 : vector<2x32xf32>
    %106 = arith.mulf %104, %105 : vector<2x32xf32>
    %107 = vector.extract_strided_slice %6 {offsets = [10, 0], sizes = [2, 128], strides = [1, 1]} : vector<16x128xf32> to vector<2x128xf32>
    %cst_24 = arith.constant dense<0.000000e+00> : vector<2x128xf32>
    %108 = tpu.matmul %106, %7, %cst_24 {dimension_numbers = #tpu.dot_dimension_numbers<[1], [0], [0], [1], [0, 0, 1, 1], [], []>} : vector<2x32xf32>, vector<32x128xf32>, vector<2x128xf32> -> vector<2x128xf32>
    %109 = arith.addf %107, %108 : vector<2x128xf32>
    %110 = vector.extract_strided_slice %109 {offsets = [0, 0], sizes = [2, 96], strides = [1, 1]} : vector<2x128xf32> to vector<2x96xf32>
    %111 = arith.negf %110 : vector<2x96xf32>
    %112 = math.exp %111 : vector<2x96xf32>
    %cst_25 = arith.constant 1.000000e+00 : f32
    %113 = vector.broadcast %cst_25 : f32 to vector<2x96xf32>
    %114 = arith.addf %113, %112 : vector<2x96xf32>
    %115 = arith.divf %113, %114 : vector<2x96xf32>
    %116 = vector.extract_strided_slice %109 {offsets = [0, 96], sizes = [2, 32], strides = [1, 1]} : vector<2x128xf32> to vector<2x32xf32>
    %117 = math.tanh %116 : vector<2x32xf32>
    %118 = vector.extract_strided_slice %115 {offsets = [0, 32], sizes = [2, 32], strides = [1, 1]} : vector<2x96xf32> to vector<2x32xf32>
    %119 = arith.mulf %118, %103 : vector<2x32xf32>
    %120 = vector.extract_strided_slice %115 {offsets = [0, 0], sizes = [2, 32], strides = [1, 1]} : vector<2x96xf32> to vector<2x32xf32>
    %121 = arith.mulf %120, %117 : vector<2x32xf32>
    %122 = arith.addf %119, %121 : vector<2x32xf32>
    %123 = vector.extract_strided_slice %115 {offsets = [0, 64], sizes = [2, 32], strides = [1, 1]} : vector<2x96xf32> to vector<2x32xf32>
    %124 = math.tanh %122 : vector<2x32xf32>
    %125 = arith.mulf %123, %124 : vector<2x32xf32>
    %126 = vector.extract_strided_slice %6 {offsets = [12, 0], sizes = [2, 128], strides = [1, 1]} : vector<16x128xf32> to vector<2x128xf32>
    %cst_26 = arith.constant dense<0.000000e+00> : vector<2x128xf32>
    %127 = tpu.matmul %125, %7, %cst_26 {dimension_numbers = #tpu.dot_dimension_numbers<[1], [0], [0], [1], [0, 0, 1, 1], [], []>} : vector<2x32xf32>, vector<32x128xf32>, vector<2x128xf32> -> vector<2x128xf32>
    %128 = arith.addf %126, %127 : vector<2x128xf32>
    %129 = vector.extract_strided_slice %128 {offsets = [0, 0], sizes = [2, 96], strides = [1, 1]} : vector<2x128xf32> to vector<2x96xf32>
    %130 = arith.negf %129 : vector<2x96xf32>
    %131 = math.exp %130 : vector<2x96xf32>
    %cst_27 = arith.constant 1.000000e+00 : f32
    %132 = vector.broadcast %cst_27 : f32 to vector<2x96xf32>
    %133 = arith.addf %132, %131 : vector<2x96xf32>
    %134 = arith.divf %132, %133 : vector<2x96xf32>
    %135 = vector.extract_strided_slice %128 {offsets = [0, 96], sizes = [2, 32], strides = [1, 1]} : vector<2x128xf32> to vector<2x32xf32>
    %136 = math.tanh %135 : vector<2x32xf32>
    %137 = vector.extract_strided_slice %134 {offsets = [0, 32], sizes = [2, 32], strides = [1, 1]} : vector<2x96xf32> to vector<2x32xf32>
    %138 = arith.mulf %137, %122 : vector<2x32xf32>
    %139 = vector.extract_strided_slice %134 {offsets = [0, 0], sizes = [2, 32], strides = [1, 1]} : vector<2x96xf32> to vector<2x32xf32>
    %140 = arith.mulf %139, %136 : vector<2x32xf32>
    %141 = arith.addf %138, %140 : vector<2x32xf32>
    %142 = vector.extract_strided_slice %134 {offsets = [0, 64], sizes = [2, 32], strides = [1, 1]} : vector<2x96xf32> to vector<2x32xf32>
    %143 = math.tanh %141 : vector<2x32xf32>
    %144 = arith.mulf %142, %143 : vector<2x32xf32>
    %145 = vector.extract_strided_slice %6 {offsets = [14, 0], sizes = [2, 128], strides = [1, 1]} : vector<16x128xf32> to vector<2x128xf32>
    %cst_28 = arith.constant dense<0.000000e+00> : vector<2x128xf32>
    %146 = tpu.matmul %144, %7, %cst_28 {dimension_numbers = #tpu.dot_dimension_numbers<[1], [0], [0], [1], [0, 0, 1, 1], [], []>} : vector<2x32xf32>, vector<32x128xf32>, vector<2x128xf32> -> vector<2x128xf32>
    %147 = arith.addf %145, %146 : vector<2x128xf32>
    %148 = vector.extract_strided_slice %147 {offsets = [0, 0], sizes = [2, 96], strides = [1, 1]} : vector<2x128xf32> to vector<2x96xf32>
    %149 = arith.negf %148 : vector<2x96xf32>
    %150 = math.exp %149 : vector<2x96xf32>
    %cst_29 = arith.constant 1.000000e+00 : f32
    %151 = vector.broadcast %cst_29 : f32 to vector<2x96xf32>
    %152 = arith.addf %151, %150 : vector<2x96xf32>
    %153 = arith.divf %151, %152 : vector<2x96xf32>
    %154 = vector.extract_strided_slice %147 {offsets = [0, 96], sizes = [2, 32], strides = [1, 1]} : vector<2x128xf32> to vector<2x32xf32>
    %155 = math.tanh %154 : vector<2x32xf32>
    %156 = vector.extract_strided_slice %153 {offsets = [0, 32], sizes = [2, 32], strides = [1, 1]} : vector<2x96xf32> to vector<2x32xf32>
    %157 = arith.mulf %156, %141 : vector<2x32xf32>
    %158 = vector.extract_strided_slice %153 {offsets = [0, 0], sizes = [2, 32], strides = [1, 1]} : vector<2x96xf32> to vector<2x32xf32>
    %159 = arith.mulf %158, %155 : vector<2x32xf32>
    %160 = arith.addf %157, %159 : vector<2x32xf32>
    %161 = vector.extract_strided_slice %153 {offsets = [0, 64], sizes = [2, 32], strides = [1, 1]} : vector<2x96xf32> to vector<2x32xf32>
    %162 = math.tanh %160 : vector<2x32xf32>
    %163 = arith.mulf %161, %162 : vector<2x32xf32>
    %c0_30 = arith.constant 0 : index
    %c0_31 = arith.constant 0 : index
    %c0_32 = arith.constant 0 : index
    %164 = vector.load %arg13[%c0_30, %c0_31, %c0_32] : memref<2x2x32xf32, #tpu.memory_space<vmem>>, vector<1x2x32xf32>
    %165 = vector.shape_cast %164 : vector<1x2x32xf32> to vector<2x32xf32>
    %166 = vector.shape_cast %163 : vector<2x32xf32> to vector<1x2x32xf32>
    tpu.vector_store %arg13[%c0_30, %c0_31, %c0_32], %166 {strides = array<i32>} : memref<2x2x32xf32, #tpu.memory_space<vmem>>, vector<1x2x32xf32>,
    %c0_33 = arith.constant 0 : index
    %c0_34 = arith.constant 0 : index
    %c0_35 = arith.constant 0 : index
    %167 = vector.load %arg14[%c0_33, %c0_34, %c0_35] : memref<2x2x32xf32, #tpu.memory_space<vmem>>, vector<1x2x32xf32>
    %168 = vector.shape_cast %167 : vector<1x2x32xf32> to vector<2x32xf32>
    %169 = vector.shape_cast %160 : vector<2x32xf32> to vector<1x2x32xf32>
    tpu.vector_store %arg14[%c0_33, %c0_34, %c0_35], %169 {strides = array<i32>} : memref<2x2x32xf32, #tpu.memory_space<vmem>>, vector<1x2x32xf32>,
    %170 = tpu.concatenate %30, %49, %68, %87, %106, %125, %144, %163 in 0 : vector<2x32xf32>, vector<2x32xf32>, vector<2x32xf32>, vector<2x32xf32>, vector<2x32xf32>, vector<2x32xf32>, vector<2x32xf32>, vector<2x32xf32> -> vector<16x32xf32>
    %c0_36 = arith.constant 0 : index
    %c0_37 = arith.constant 0 : index
    %171 = vector.load %arg7[%c0_36, %c0_37] : memref<32x128xf32, #tpu.memory_space<vmem>>, vector<32x128xf32>
    %cst_38 = arith.constant dense<0.000000e+00> : vector<16x128xf32>
    %172 = tpu.matmul %170, %171, %cst_38 {dimension_numbers = #tpu.dot_dimension_numbers<[1], [0], [0], [1], [0, 0, 1, 1], [], []>} : vector<16x32xf32>, vector<32x128xf32>, vector<16x128xf32> -> vector<16x128xf32>
    %c0_39 = arith.constant 0 : index
    %c0_40 = arith.constant 0 : index
    %173 = vector.load %arg9[%c0_39, %c0_40] : memref<1x128xf32, #tpu.memory_space<vmem>>, vector<1x128xf32>
    %174 = vector.broadcast %173 : vector<1x128xf32> to vector<16x128xf32>
    %175 = arith.addf %172, %174 : vector<16x128xf32>
    %c0_41 = arith.constant 0 : index
    %c0_42 = arith.constant 0 : index
    %176 = vector.load %arg8[%c0_41, %c0_42] : memref<32x128xf32, #tpu.memory_space<vmem>>, vector<32x128xf32>
    %c1 = arith.constant 1 : index
    %c0_43 = arith.constant 0 : index
    %c0_44 = arith.constant 0 : index
    %177 = vector.load %arg2[%c1, %c0_43, %c0_44] : memref<2x2x32xf32, #tpu.memory_space<vmem>>, vector<1x2x32xf32>
    %178 = vector.shape_cast %177 : vector<1x2x32xf32> to vector<2x32xf32>
    %c1_45 = arith.constant 1 : index
    %c0_46 = arith.constant 0 : index
    %c0_47 = arith.constant 0 : index
    %179 = vector.load %arg3[%c1_45, %c0_46, %c0_47] : memref<2x2x32xf32, #tpu.memory_space<vmem>>, vector<1x2x32xf32>
    %180 = vector.shape_cast %179 : vector<1x2x32xf32> to vector<2x32xf32>
    %181 = vector.extract_strided_slice %175 {offsets = [0, 0], sizes = [2, 128], strides = [1, 1]} : vector<16x128xf32> to vector<2x128xf32>
    %cst_48 = arith.constant dense<0.000000e+00> : vector<2x128xf32>
    %182 = tpu.matmul %178, %176, %cst_48 {dimension_numbers = #tpu.dot_dimension_numbers<[1], [0], [0], [1], [0, 0, 1, 1], [], []>} : vector<2x32xf32>, vector<32x128xf32>, vector<2x128xf32> -> vector<2x128xf32>
    %183 = arith.addf %181, %182 : vector<2x128xf32>
    %184 = vector.extract_strided_slice %183 {offsets = [0, 0], sizes = [2, 96], strides = [1, 1]} : vector<2x128xf32> to vector<2x96xf32>
    %185 = arith.negf %184 : vector<2x96xf32>
    %186 = math.exp %185 : vector<2x96xf32>
    %cst_49 = arith.constant 1.000000e+00 : f32
    %187 = vector.broadcast %cst_49 : f32 to vector<2x96xf32>
    %188 = arith.addf %187, %186 : vector<2x96xf32>
    %189 = arith.divf %187, %188 : vector<2x96xf32>
    %190 = vector.extract_strided_slice %183 {offsets = [0, 96], sizes = [2, 32], strides = [1, 1]} : vector<2x128xf32> to vector<2x32xf32>
    %191 = math.tanh %190 : vector<2x32xf32>
    %192 = vector.extract_strided_slice %189 {offsets = [0, 32], sizes = [2, 32], strides = [1, 1]} : vector<2x96xf32> to vector<2x32xf32>
    %193 = arith.mulf %192, %180 : vector<2x32xf32>
    %194 = vector.extract_strided_slice %189 {offsets = [0, 0], sizes = [2, 32], strides = [1, 1]} : vector<2x96xf32> to vector<2x32xf32>
    %195 = arith.mulf %194, %191 : vector<2x32xf32>
    %196 = arith.addf %193, %195 : vector<2x32xf32>
    %197 = vector.extract_strided_slice %189 {offsets = [0, 64], sizes = [2, 32], strides = [1, 1]} : vector<2x96xf32> to vector<2x32xf32>
    %198 = math.tanh %196 : vector<2x32xf32>
    %199 = arith.mulf %197, %198 : vector<2x32xf32>
    %200 = vector.extract_strided_slice %175 {offsets = [2, 0], sizes = [2, 128], strides = [1, 1]} : vector<16x128xf32> to vector<2x128xf32>
    %cst_50 = arith.constant dense<0.000000e+00> : vector<2x128xf32>
    %201 = tpu.matmul %199, %176, %cst_50 {dimension_numbers = #tpu.dot_dimension_numbers<[1], [0], [0], [1], [0, 0, 1, 1], [], []>} : vector<2x32xf32>, vector<32x128xf32>, vector<2x128xf32> -> vector<2x128xf32>
    %202 = arith.addf %200, %201 : vector<2x128xf32>
    %203 = vector.extract_strided_slice %202 {offsets = [0, 0], sizes = [2, 96], strides = [1, 1]} : vector<2x128xf32> to vector<2x96xf32>
    %204 = arith.negf %203 : vector<2x96xf32>
    %205 = math.exp %204 : vector<2x96xf32>
    %cst_51 = arith.constant 1.000000e+00 : f32
    %206 = vector.broadcast %cst_51 : f32 to vector<2x96xf32>
    %207 = arith.addf %206, %205 : vector<2x96xf32>
    %208 = arith.divf %206, %207 : vector<2x96xf32>
    %209 = vector.extract_strided_slice %202 {offsets = [0, 96], sizes = [2, 32], strides = [1, 1]} : vector<2x128xf32> to vector<2x32xf32>
    %210 = math.tanh %209 : vector<2x32xf32>
    %211 = vector.extract_strided_slice %208 {offsets = [0, 32], sizes = [2, 32], strides = [1, 1]} : vector<2x96xf32> to vector<2x32xf32>
    %212 = arith.mulf %211, %196 : vector<2x32xf32>
    %213 = vector.extract_strided_slice %208 {offsets = [0, 0], sizes = [2, 32], strides = [1, 1]} : vector<2x96xf32> to vector<2x32xf32>
    %214 = arith.mulf %213, %210 : vector<2x32xf32>
    %215 = arith.addf %212, %214 : vector<2x32xf32>
    %216 = vector.extract_strided_slice %208 {offsets = [0, 64], sizes = [2, 32], strides = [1, 1]} : vector<2x96xf32> to vector<2x32xf32>
    %217 = math.tanh %215 : vector<2x32xf32>
    %218 = arith.mulf %216, %217 : vector<2x32xf32>
    %219 = vector.extract_strided_slice %175 {offsets = [4, 0], sizes = [2, 128], strides = [1, 1]} : vector<16x128xf32> to vector<2x128xf32>
    %cst_52 = arith.constant dense<0.000000e+00> : vector<2x128xf32>
    %220 = tpu.matmul %218, %176, %cst_52 {dimension_numbers = #tpu.dot_dimension_numbers<[1], [0], [0], [1], [0, 0, 1, 1], [], []>} : vector<2x32xf32>, vector<32x128xf32>, vector<2x128xf32> -> vector<2x128xf32>
    %221 = arith.addf %219, %220 : vector<2x128xf32>
    %222 = vector.extract_strided_slice %221 {offsets = [0, 0], sizes = [2, 96], strides = [1, 1]} : vector<2x128xf32> to vector<2x96xf32>
    %223 = arith.negf %222 : vector<2x96xf32>
    %224 = math.exp %223 : vector<2x96xf32>
    %cst_53 = arith.constant 1.000000e+00 : f32
    %225 = vector.broadcast %cst_53 : f32 to vector<2x96xf32>
    %226 = arith.addf %225, %224 : vector<2x96xf32>
    %227 = arith.divf %225, %226 : vector<2x96xf32>
    %228 = vector.extract_strided_slice %221 {offsets = [0, 96], sizes = [2, 32], strides = [1, 1]} : vector<2x128xf32> to vector<2x32xf32>
    %229 = math.tanh %228 : vector<2x32xf32>
    %230 = vector.extract_strided_slice %227 {offsets = [0, 32], sizes = [2, 32], strides = [1, 1]} : vector<2x96xf32> to vector<2x32xf32>
    %231 = arith.mulf %230, %215 : vector<2x32xf32>
    %232 = vector.extract_strided_slice %227 {offsets = [0, 0], sizes = [2, 32], strides = [1, 1]} : vector<2x96xf32> to vector<2x32xf32>
    %233 = arith.mulf %232, %229 : vector<2x32xf32>
    %234 = arith.addf %231, %233 : vector<2x32xf32>
    %235 = vector.extract_strided_slice %227 {offsets = [0, 64], sizes = [2, 32], strides = [1, 1]} : vector<2x96xf32> to vector<2x32xf32>
    %236 = math.tanh %234 : vector<2x32xf32>
    %237 = arith.mulf %235, %236 : vector<2x32xf32>
    %238 = vector.extract_strided_slice %175 {offsets = [6, 0], sizes = [2, 128], strides = [1, 1]} : vector<16x128xf32> to vector<2x128xf32>
    %cst_54 = arith.constant dense<0.000000e+00> : vector<2x128xf32>
    %239 = tpu.matmul %237, %176, %cst_54 {dimension_numbers = #tpu.dot_dimension_numbers<[1], [0], [0], [1], [0, 0, 1, 1], [], []>} : vector<2x32xf32>, vector<32x128xf32>, vector<2x128xf32> -> vector<2x128xf32>
    %240 = arith.addf %238, %239 : vector<2x128xf32>
    %241 = vector.extract_strided_slice %240 {offsets = [0, 0], sizes = [2, 96], strides = [1, 1]} : vector<2x128xf32> to vector<2x96xf32>
    %242 = arith.negf %241 : vector<2x96xf32>
    %243 = math.exp %242 : vector<2x96xf32>
    %cst_55 = arith.constant 1.000000e+00 : f32
    %244 = vector.broadcast %cst_55 : f32 to vector<2x96xf32>
    %245 = arith.addf %244, %243 : vector<2x96xf32>
    %246 = arith.divf %244, %245 : vector<2x96xf32>
    %247 = vector.extract_strided_slice %240 {offsets = [0, 96], sizes = [2, 32], strides = [1, 1]} : vector<2x128xf32> to vector<2x32xf32>
    %248 = math.tanh %247 : vector<2x32xf32>
    %249 = vector.extract_strided_slice %246 {offsets = [0, 32], sizes = [2, 32], strides = [1, 1]} : vector<2x96xf32> to vector<2x32xf32>
    %250 = arith.mulf %249, %234 : vector<2x32xf32>
    %251 = vector.extract_strided_slice %246 {offsets = [0, 0], sizes = [2, 32], strides = [1, 1]} : vector<2x96xf32> to vector<2x32xf32>
    %252 = arith.mulf %251, %248 : vector<2x32xf32>
    %253 = arith.addf %250, %252 : vector<2x32xf32>
    %254 = vector.extract_strided_slice %246 {offsets = [0, 64], sizes = [2, 32], strides = [1, 1]} : vector<2x96xf32> to vector<2x32xf32>
    %255 = math.tanh %253 : vector<2x32xf32>
    %256 = arith.mulf %254, %255 : vector<2x32xf32>
    %257 = vector.extract_strided_slice %175 {offsets = [8, 0], sizes = [2, 128], strides = [1, 1]} : vector<16x128xf32> to vector<2x128xf32>
    %cst_56 = arith.constant dense<0.000000e+00> : vector<2x128xf32>
    %258 = tpu.matmul %256, %176, %cst_56 {dimension_numbers = #tpu.dot_dimension_numbers<[1], [0], [0], [1], [0, 0, 1, 1], [], []>} : vector<2x32xf32>, vector<32x128xf32>, vector<2x128xf32> -> vector<2x128xf32>
    %259 = arith.addf %257, %258 : vector<2x128xf32>
    %260 = vector.extract_strided_slice %259 {offsets = [0, 0], sizes = [2, 96], strides = [1, 1]} : vector<2x128xf32> to vector<2x96xf32>
    %261 = arith.negf %260 : vector<2x96xf32>
    %262 = math.exp %261 : vector<2x96xf32>
    %cst_57 = arith.constant 1.000000e+00 : f32
    %263 = vector.broadcast %cst_57 : f32 to vector<2x96xf32>
    %264 = arith.addf %263, %262 : vector<2x96xf32>
    %265 = arith.divf %263, %264 : vector<2x96xf32>
    %266 = vector.extract_strided_slice %259 {offsets = [0, 96], sizes = [2, 32], strides = [1, 1]} : vector<2x128xf32> to vector<2x32xf32>
    %267 = math.tanh %266 : vector<2x32xf32>
    %268 = vector.extract_strided_slice %265 {offsets = [0, 32], sizes = [2, 32], strides = [1, 1]} : vector<2x96xf32> to vector<2x32xf32>
    %269 = arith.mulf %268, %253 : vector<2x32xf32>
    %270 = vector.extract_strided_slice %265 {offsets = [0, 0], sizes = [2, 32], strides = [1, 1]} : vector<2x96xf32> to vector<2x32xf32>
    %271 = arith.mulf %270, %267 : vector<2x32xf32>
    %272 = arith.addf %269, %271 : vector<2x32xf32>
    %273 = vector.extract_strided_slice %265 {offsets = [0, 64], sizes = [2, 32], strides = [1, 1]} : vector<2x96xf32> to vector<2x32xf32>
    %274 = math.tanh %272 : vector<2x32xf32>
    %275 = arith.mulf %273, %274 : vector<2x32xf32>
    %276 = vector.extract_strided_slice %175 {offsets = [10, 0], sizes = [2, 128], strides = [1, 1]} : vector<16x128xf32> to vector<2x128xf32>
    %cst_58 = arith.constant dense<0.000000e+00> : vector<2x128xf32>
    %277 = tpu.matmul %275, %176, %cst_58 {dimension_numbers = #tpu.dot_dimension_numbers<[1], [0], [0], [1], [0, 0, 1, 1], [], []>} : vector<2x32xf32>, vector<32x128xf32>, vector<2x128xf32> -> vector<2x128xf32>
    %278 = arith.addf %276, %277 : vector<2x128xf32>
    %279 = vector.extract_strided_slice %278 {offsets = [0, 0], sizes = [2, 96], strides = [1, 1]} : vector<2x128xf32> to vector<2x96xf32>
    %280 = arith.negf %279 : vector<2x96xf32>
    %281 = math.exp %280 : vector<2x96xf32>
    %cst_59 = arith.constant 1.000000e+00 : f32
    %282 = vector.broadcast %cst_59 : f32 to vector<2x96xf32>
    %283 = arith.addf %282, %281 : vector<2x96xf32>
    %284 = arith.divf %282, %283 : vector<2x96xf32>
    %285 = vector.extract_strided_slice %278 {offsets = [0, 96], sizes = [2, 32], strides = [1, 1]} : vector<2x128xf32> to vector<2x32xf32>
    %286 = math.tanh %285 : vector<2x32xf32>
    %287 = vector.extract_strided_slice %284 {offsets = [0, 32], sizes = [2, 32], strides = [1, 1]} : vector<2x96xf32> to vector<2x32xf32>
    %288 = arith.mulf %287, %272 : vector<2x32xf32>
    %289 = vector.extract_strided_slice %284 {offsets = [0, 0], sizes = [2, 32], strides = [1, 1]} : vector<2x96xf32> to vector<2x32xf32>
    %290 = arith.mulf %289, %286 : vector<2x32xf32>
    %291 = arith.addf %288, %290 : vector<2x32xf32>
    %292 = vector.extract_strided_slice %284 {offsets = [0, 64], sizes = [2, 32], strides = [1, 1]} : vector<2x96xf32> to vector<2x32xf32>
    %293 = math.tanh %291 : vector<2x32xf32>
    %294 = arith.mulf %292, %293 : vector<2x32xf32>
    %295 = vector.extract_strided_slice %175 {offsets = [12, 0], sizes = [2, 128], strides = [1, 1]} : vector<16x128xf32> to vector<2x128xf32>
    %cst_60 = arith.constant dense<0.000000e+00> : vector<2x128xf32>
    %296 = tpu.matmul %294, %176, %cst_60 {dimension_numbers = #tpu.dot_dimension_numbers<[1], [0], [0], [1], [0, 0, 1, 1], [], []>} : vector<2x32xf32>, vector<32x128xf32>, vector<2x128xf32> -> vector<2x128xf32>
    %297 = arith.addf %295, %296 : vector<2x128xf32>
    %298 = vector.extract_strided_slice %297 {offsets = [0, 0], sizes = [2, 96], strides = [1, 1]} : vector<2x128xf32> to vector<2x96xf32>
    %299 = arith.negf %298 : vector<2x96xf32>
    %300 = math.exp %299 : vector<2x96xf32>
    %cst_61 = arith.constant 1.000000e+00 : f32
    %301 = vector.broadcast %cst_61 : f32 to vector<2x96xf32>
    %302 = arith.addf %301, %300 : vector<2x96xf32>
    %303 = arith.divf %301, %302 : vector<2x96xf32>
    %304 = vector.extract_strided_slice %297 {offsets = [0, 96], sizes = [2, 32], strides = [1, 1]} : vector<2x128xf32> to vector<2x32xf32>
    %305 = math.tanh %304 : vector<2x32xf32>
    %306 = vector.extract_strided_slice %303 {offsets = [0, 32], sizes = [2, 32], strides = [1, 1]} : vector<2x96xf32> to vector<2x32xf32>
    %307 = arith.mulf %306, %291 : vector<2x32xf32>
    %308 = vector.extract_strided_slice %303 {offsets = [0, 0], sizes = [2, 32], strides = [1, 1]} : vector<2x96xf32> to vector<2x32xf32>
    %309 = arith.mulf %308, %305 : vector<2x32xf32>
    %310 = arith.addf %307, %309 : vector<2x32xf32>
    %311 = vector.extract_strided_slice %303 {offsets = [0, 64], sizes = [2, 32], strides = [1, 1]} : vector<2x96xf32> to vector<2x32xf32>
    %312 = math.tanh %310 : vector<2x32xf32>
    %313 = arith.mulf %311, %312 : vector<2x32xf32>
    %314 = vector.extract_strided_slice %175 {offsets = [14, 0], sizes = [2, 128], strides = [1, 1]} : vector<16x128xf32> to vector<2x128xf32>
    %cst_62 = arith.constant dense<0.000000e+00> : vector<2x128xf32>
    %315 = tpu.matmul %313, %176, %cst_62 {dimension_numbers = #tpu.dot_dimension_numbers<[1], [0], [0], [1], [0, 0, 1, 1], [], []>} : vector<2x32xf32>, vector<32x128xf32>, vector<2x128xf32> -> vector<2x128xf32>
    %316 = arith.addf %314, %315 : vector<2x128xf32>
    %317 = vector.extract_strided_slice %316 {offsets = [0, 0], sizes = [2, 96], strides = [1, 1]} : vector<2x128xf32> to vector<2x96xf32>
    %318 = arith.negf %317 : vector<2x96xf32>
    %319 = math.exp %318 : vector<2x96xf32>
    %cst_63 = arith.constant 1.000000e+00 : f32
    %320 = vector.broadcast %cst_63 : f32 to vector<2x96xf32>
    %321 = arith.addf %320, %319 : vector<2x96xf32>
    %322 = arith.divf %320, %321 : vector<2x96xf32>
    %323 = vector.extract_strided_slice %316 {offsets = [0, 96], sizes = [2, 32], strides = [1, 1]} : vector<2x128xf32> to vector<2x32xf32>
    %324 = math.tanh %323 : vector<2x32xf32>
    %325 = vector.extract_strided_slice %322 {offsets = [0, 32], sizes = [2, 32], strides = [1, 1]} : vector<2x96xf32> to vector<2x32xf32>
    %326 = arith.mulf %325, %310 : vector<2x32xf32>
    %327 = vector.extract_strided_slice %322 {offsets = [0, 0], sizes = [2, 32], strides = [1, 1]} : vector<2x96xf32> to vector<2x32xf32>
    %328 = arith.mulf %327, %324 : vector<2x32xf32>
    %329 = arith.addf %326, %328 : vector<2x32xf32>
    %330 = vector.extract_strided_slice %322 {offsets = [0, 64], sizes = [2, 32], strides = [1, 1]} : vector<2x96xf32> to vector<2x32xf32>
    %331 = math.tanh %329 : vector<2x32xf32>
    %332 = arith.mulf %330, %331 : vector<2x32xf32>
    %c1_64 = arith.constant 1 : index
    %c0_65 = arith.constant 0 : index
    %c0_66 = arith.constant 0 : index
    %333 = vector.load %arg13[%c1_64, %c0_65, %c0_66] : memref<2x2x32xf32, #tpu.memory_space<vmem>>, vector<1x2x32xf32>
    %334 = vector.shape_cast %333 : vector<1x2x32xf32> to vector<2x32xf32>
    %335 = vector.shape_cast %332 : vector<2x32xf32> to vector<1x2x32xf32>
    tpu.vector_store %arg13[%c1_64, %c0_65, %c0_66], %335 {strides = array<i32>} : memref<2x2x32xf32, #tpu.memory_space<vmem>>, vector<1x2x32xf32>,
    %c1_67 = arith.constant 1 : index
    %c0_68 = arith.constant 0 : index
    %c0_69 = arith.constant 0 : index
    %336 = vector.load %arg14[%c1_67, %c0_68, %c0_69] : memref<2x2x32xf32, #tpu.memory_space<vmem>>, vector<1x2x32xf32>
    %337 = vector.shape_cast %336 : vector<1x2x32xf32> to vector<2x32xf32>
    %338 = vector.shape_cast %329 : vector<2x32xf32> to vector<1x2x32xf32>
    tpu.vector_store %arg14[%c1_67, %c0_68, %c0_69], %338 {strides = array<i32>} : memref<2x2x32xf32, #tpu.memory_space<vmem>>, vector<1x2x32xf32>,
    %339 = tpu.concatenate %199, %218, %237, %256, %275, %294, %313, %332 in 0 : vector<2x32xf32>, vector<2x32xf32>, vector<2x32xf32>, vector<2x32xf32>, vector<2x32xf32>, vector<2x32xf32>, vector<2x32xf32>, vector<2x32xf32> -> vector<16x32xf32>
    %c0_70 = arith.constant 0 : index
    %c0_71 = arith.constant 0 : index
    %340 = vector.load %arg10[%c0_70, %c0_71] : memref<32x128xf32, #tpu.memory_space<vmem>>, vector<32x128xf32>
    %cst_72 = arith.constant dense<0.000000e+00> : vector<16x128xf32>
    %341 = tpu.matmul %339, %340, %cst_72 {dimension_numbers = #tpu.dot_dimension_numbers<[1], [0], [0], [1], [0, 0, 1, 1], [], []>} : vector<16x32xf32>, vector<32x128xf32>, vector<16x128xf32> -> vector<16x128xf32>
    %c0_73 = arith.constant 0 : index
    %c0_74 = arith.constant 0 : index
    %342 = vector.load %arg11[%c0_73, %c0_74] : memref<1x128xf32, #tpu.memory_space<vmem>>, vector<1x128xf32>
    %343 = vector.broadcast %342 : vector<1x128xf32> to vector<16x128xf32>
    %344 = arith.addf %341, %343 : vector<16x128xf32>
    %345 = vector.shape_cast %344 : vector<16x128xf32> to vector<8x2x128xf32>
    %c0_75 = arith.constant 0 : index
    %c0_76 = arith.constant 0 : index
    %c0_77 = arith.constant 0 : index
    %346 = vector.load %arg12[%c0_75, %c0_76, %c0_77] : memref<8x2x128xf32, #tpu.memory_space<vmem>>, vector<8x2x128xf32>
    tpu.vector_store %arg12[%c0_75, %c0_76, %c0_77], %345 {strides = array<i32>} : memref<8x2x128xf32, #tpu.memory_space<vmem>>, vector<8x2x128xf32>,
    return
  }
  func.func @transform_0(%arg0: i32) -> (i32, i32, i32) {
    %c0_i32 = arith.constant 0 : i32
    %c0_i32_0 = arith.constant 0 : i32
    %c0_i32_1 = arith.constant 0 : i32
    return %c0_i32, %arg0, %c0_i32_0 : i32, i32, i32
  }
  func.func @transform_1(%arg0: i32) -> (i32, i32, i32) {
    %c0_i32 = arith.constant 0 : i32
    %c0_i32_0 = arith.constant 0 : i32
    %c0_i32_1 = arith.constant 0 : i32
    return %c0_i32, %arg0, %c0_i32_0 : i32, i32, i32
  }
  func.func @transform_2(%arg0: i32) -> (i32, i32, i32) {
    %c0_i32 = arith.constant 0 : i32
    %c0_i32_0 = arith.constant 0 : i32
    %c0_i32_1 = arith.constant 0 : i32
    return %c0_i32, %arg0, %c0_i32_0 : i32, i32, i32
  }
  func.func @transform_3(%arg0: i32) -> (i32, i32) {
    %c0_i32 = arith.constant 0 : i32
    %c0_i32_0 = arith.constant 0 : i32
    %c0_i32_1 = arith.constant 0 : i32
    return %c0_i32, %c0_i32_0 : i32, i32
  }
  func.func @transform_4(%arg0: i32) -> (i32, i32) {
    %c0_i32 = arith.constant 0 : i32
    %c0_i32_0 = arith.constant 0 : i32
    %c0_i32_1 = arith.constant 0 : i32
    return %c0_i32, %c0_i32_0 : i32, i32
  }
  func.func @transform_5(%arg0: i32) -> (i32, i32) {
    %c0_i32 = arith.constant 0 : i32
    %c0_i32_0 = arith.constant 0 : i32
    %c0_i32_1 = arith.constant 0 : i32
    return %c0_i32, %c0_i32_0 : i32, i32
  }
  func.func @transform_6(%arg0: i32) -> (i32, i32) {
    %c0_i32 = arith.constant 0 : i32
    %c0_i32_0 = arith.constant 0 : i32
    %c0_i32_1 = arith.constant 0 : i32
    return %c0_i32, %c0_i32_0 : i32, i32
  }
  func.func @transform_7(%arg0: i32) -> (i32, i32) {
    %c0_i32 = arith.constant 0 : i32
    %c0_i32_0 = arith.constant 0 : i32
    %c0_i32_1 = arith.constant 0 : i32
    return %c0_i32, %c0_i32_0 : i32, i32
  }
  func.func @transform_8(%arg0: i32) -> (i32, i32) {
    %c0_i32 = arith.constant 0 : i32
    %c0_i32_0 = arith.constant 0 : i32
    %c0_i32_1 = arith.constant 0 : i32
    return %c0_i32, %c0_i32_0 : i32, i32
  }
  func.func @transform_9(%arg0: i32) -> (i32, i32) {
    %c0_i32 = arith.constant 0 : i32
    %c0_i32_0 = arith.constant 0 : i32
    %c0_i32_1 = arith.constant 0 : i32
    return %c0_i32, %c0_i32_0 : i32, i32
  }
  func.func @transform_10(%arg0: i32) -> (i32, i32) {
    %c0_i32 = arith.constant 0 : i32
    %c0_i32_0 = arith.constant 0 : i32
    %c0_i32_1 = arith.constant 0 : i32
    return %c0_i32, %c0_i32_0 : i32, i32
  }
  func.func @transform_11(%arg0: i32) -> (i32, i32, i32) {
    %c0_i32 = arith.constant 0 : i32
    %c0_i32_0 = arith.constant 0 : i32
    %c0_i32_1 = arith.constant 0 : i32
    return %c0_i32, %arg0, %c0_i32_0 : i32, i32, i32
  }
  func.func @transform_12(%arg0: i32) -> (i32, i32, i32) {
    %c0_i32 = arith.constant 0 : i32
    %c0_i32_0 = arith.constant 0 : i32
    %c0_i32_1 = arith.constant 0 : i32
    return %c0_i32, %arg0, %c0_i32_0 : i32, i32, i32
  }
  func.func @transform_13(%arg0: i32) -> (i32, i32, i32) {
    %c0_i32 = arith.constant 0 : i32
    %c0_i32_0 = arith.constant 0 : i32
    %c0_i32_1 = arith.constant 0 : i32
    return %c0_i32, %arg0, %c0_i32_0 : i32, i32, i32
  }
}

</mosaic_0001>

<bundles_post_ra>
// kernel: decoder_forward.1
= control target key start
LH: loop header
LB: loop body
LE: loop exit
PB: predicated region body
PF: predicated region fallthrough
CT: control target
= control target key end

     0   :  { %19 = vsyncpa [#allocation3], 0  ;;  %v75_v3 = vlaneseq  ;;  %v2775_v4 = vmov 0.0   ;;  %v2776_v7 = vmov 1983009808   ;;  %s3331_s0 = inlined_call_operand.vmem [shape: f32[8,2,32], index: 0, kind: input, shape index: {}]   ;;  %s3332_s1 = inlined_call_operand.vmem [shape: f32[2,2,32], index: 1, kind: input, shape index: {}]   ;;  %s3333_s2 = inlined_call_operand.vmem [shape: f32[2,2,32], index: 2, kind: input, shape index: {}]   ;;  %s3334_s3 = inlined_call_operand.vmem [shape: f32[32,128], index: 3, kind: input, shape index: {}]   ;;  %s3335_s4 = inlined_call_operand.vmem [shape: f32[32,128], index: 4, kind: input, shape index: {}]   ;;  %s3336_s5 = inlined_call_operand.vmem [shape: f32[1,128], index: 5, kind: input, shape index: {}]   ;;  %s3337_s6 = inlined_call_operand.vmem [shape: f32[32,128], index: 6, kind: input, shape index: {}]   ;;  %s3338_s7 = inlined_call_operand.vmem [shape: f32[32,128], index: 7, kind: input, shape index: {}]   ;;  %s3339_s8 = inlined_call_operand.vmem [shape: f32[1,128], index: 8, kind: input, shape index: {}]   ;;  %s3340_s9 = inlined_call_operand.vmem [shape: f32[32,128], index: 9, kind: input, shape index: {}]   ;;  %s3341_s10 = inlined_call_operand.vmem [shape: f32[1,128], index: 10, kind: input, shape index: {}]   ;;  %s3342_s11 = inlined_call_operand.hbm [shape: f32[8,2,128], index: 11, kind: output, shape index: {0}]   ;;  %s3343_s12 = inlined_call_operand.hbm [shape: f32[2,2,32], index: 12, kind: output, shape index: {1}]   ;;  %s3344_s13 = inlined_call_operand.hbm [shape: f32[2,2,32], index: 13, kind: output, shape index: {2}]  }
   0x1   :  { %v54_v0 = vld [vmem:[%s3334_s3 + $0x18] sm:$0xff]  ;;  %v53_v1 = vld [vmem:[%s3334_s3 + $0x10] sm:$0xff]  ;;  %2375 = vmatprep.subr.mxu1 %v2775_v4  ;;  %v52_v5 = vld [vmem:[%s3334_s3 + $0x8] sm:$0xff]  ;;  %v73_v8 = vunpack.c.l.s4 %v2776_v7 }
   0x2   :  { %v2864_v2 = vld [vmem:[%s3335_s4 + $0x18] sm:$0xff]  ;;  %2364 = vmatprep.subr.mxu0 %v54_v0  ;;  %v2873_v6 = vld [vmem:[%s3335_s4 + $0x10] sm:$0xff]  ;;  %v51_v9 = vld [vmem:[%s3334_s3] sm:$0xff]  ;;  %v76_v16 = vshrl.u32 %v75_v3, 7 }
   0x3   :  { %2365 = vmatpush3.msra.mxu0 %v54_v0  ;;  %2376 = vmatpush3.msra.mxu1 %v2864_v2  ;;  %v43_v10 = vld [vmem:[%s3331_s0] sm:$0x3]  ;;  %v44_v11 = vld [vmem:[%s3331_s0 + $0x2] sm:$0x3]  ;;  %v45_v12 = vld [vmem:[%s3331_s0 + $0x4] sm:$0x3]  ;;  %v74_v15 = vunpack.c.0.s8 %v73_v8 }
   0x4   :  { %2366 = vmatprep.subr.mxu0 %v53_v1  ;;  %2377 = vmatprep.subr.mxu1 %v2775_v4  ;;  %v46_v13 = vld [vmem:[%s3331_s0 + $0x6] sm:$0x3]  ;;  %v70_v14 = vcombine.low %v43_v10, %v44_v11  ;;  %v2895_v17 = vld [vmem:[%s3335_s4 + $0x8] sm:$0xff] }
   0x5   :  { %v47_v18 = vld [vmem:[%s3331_s0 + $0x8] sm:$0x3]  ;;  %2367 = vmatpush3.msra.mxu0 %v53_v1  ;;  %2378 = vmatpush3.msra.mxu1 %v2873_v6  ;;  %v71_v19 = vcombine.low %v45_v12, %v46_v13  ;;  %v48_v20 = vld [vmem:[%s3331_s0 + $0xa] sm:$0x3]  ;;  %v49_v21 = vld [vmem:[%s3331_s0 + $0xc] sm:$0x3]  ;;  %v2911_v23 = vsub.s32 %v74_v15, %v76_v16 }
   0x6   :  { %v50_v22 = vld [vmem:[%s3331_s0 + $0xe] sm:$0x3]  ;;  %2368 = vmatprep.subr.mxu0 %v52_v5  ;;  %2379 = vmatprep.subr.mxu1 %v2775_v4  ;;  %v87_v24 = vcombine.low %v47_v18, %v48_v20 }
   0x7   :  { %v88_v25 = vcombine.low %v49_v21, %v50_v22 }
   0x8   :  { %20 = vsyncpa [#allocation5], 0  ;;  %2369 = vmatpush3.msra.mxu0 %v52_v5  ;;  %2380 = vmatpush3.msra.mxu1 %v2895_v17  ;;  %v2917_v26 = vld [vmem:[%s3335_s4] sm:$0xff]  ;;  %v78_v27 = vrot.slane %v70_v14, %v2911_v23  ;;  %v85_v28 = vrot.slane %v71_v19, %v2911_v23  ;;  %v95_v29 = vrot.slane %v87_v24, %v2911_v23  ;;  %vm104_vm0 = vcmask 261120   ;;  %s2778_s24 = smov 32  }
   0x9   :  { %2370 = vmatprep.subr.mxu0 %v51_v9  ;;  %v102_v30 = vrot.slane %v88_v25, %v2911_v23  ;;  %v188_v31 = vld [vmem:[%s3332_s1] sm:$0x3]  ;;  %2381 = vmatprep.subr.mxu1 %v2775_v4  ;;  %vm2777_vm1 = vmmov 0   ;;  %vm1047_vm2 = vcmask 1041408   ;;  %vm1049_vm3 = vcmask 1043456  }
   0xa   :  { %2371 = vmatpush3.msra.mxu0 %v51_v9  ;;  %v86_v32 = vcombine.low %v78_v27, %v85_v28  ;;  %2382 = vmatpush3.msra.mxu1 %v2917_v26  ;;  %v2219_v34 = vld [vmem:[%s3336_s5] ss:$0 sm:$0xff]  ;;  %s2779_s5 = smov 64   ;;  %vm1051_vm4 = vcmask 1045504   ;;  %vm1040_vm5 = vcmask 261126  }
   0xb   :  { %v103_v33 = vcombine.low %v95_v29, %v102_v30  ;;  %2383 = vmatprep.mubr.msk.f32.mxu1 %vm2777_vm1, %v2775_v4  ;;  %2386 = vmatprep.subr.mxu0 %v2775_v4  ;;  %v189_v43 = vld [vmem:[%s3333_s2] sm:$0x3] }
   0xc   :  { %2384 = vmatmul.mubr.msk.f32.vlgmr.msra.gmra.mxu1 %vm104_vm0, %v188_v31  ;;  %2372 = vmatprep.mubr.msk.f32.mxu0 %vm104_vm0, %v86_v32 }
   0xd   :  { %2397 = vmatprep.subr.mxu1 %v2775_v4  ;;  %2373 = vmatmul.mubr.msk.f32.vlgmr.msra.gmra.mxu0 %vm104_vm0, %v103_v33 }
   0xe   :  { %2398 = vmatpush3.msra.mxu1 %v2864_v2  ;;  %2387 = vmatpush3.msra.mxu0 %v2864_v2 }
   0xf   :  { %2394 = vmatprep.mubr.msk.f32.mxu0 %vm2777_vm1, %v2775_v4  ;;  %2388 = vmatprep.subr.mxu0 %v2775_v4 }
  0x10   :  { %2399 = vmatprep.subr.mxu1 %v2775_v4  ;;  %2389 = vmatpush3.msra.mxu0 %v2873_v6 }
  0x11   :  { %2400 = vmatpush3.msra.mxu1 %v2873_v6  ;;  %2390 = vmatprep.subr.mxu0 %v2775_v4 }
  0x12   :  { %2401 = vmatprep.subr.mxu1 %v2775_v4  ;;  %2391 = vmatpush3.msra.mxu0 %v2895_v17 }
  0x13   :  { %2402 = vmatpush3.msra.mxu1 %v2895_v17  ;;  %2392 = vmatprep.subr.mxu0 %v2775_v4 }
  0x14   :  { %2403 = vmatprep.subr.mxu1 %v2775_v4  ;;  %2393 = vmatpush3.msra.mxu0 %v2917_v26 }
  0x15   :  { %2404 = vmatpush3.msra.mxu1 %v2917_v26  ;;  %2405 = vmatprep.mubr.msk.f32.mxu1 %vm2777_vm1, %v2775_v4 }
  0x16   :  { %2408 = vmatprep.subr.mxu0 %v2775_v4  ;;  %2419 = vmatprep.subr.mxu1 %v2775_v4 }
  0xcc   :  { %v259_v35 = vpop.f32.mrf.mxu1 }
  0xcd   :  { %v2374_v36 = vpop.f32.mrf.mxu0 }
  0xce   :  { %v2385_v37 = vpop.f32.mrf.mxu1  ;;  %v2958_v38 = vadd.f32 %v2374_v36, %v2219_v34 }
  0xcf   :  { %v175_v39 = vpop.f32.mrf.mxu0 }
  0xd0   :  { %v2960_v40 = vadd.f32 %v2219_v34, %v175_v39 }
  0xd2   :  { %v263_v41 = vadd.f32 %v259_v35, %v2960_v40 }
  0xd4   :  { %2583 = vtanh.f32 %v263_v41  ;;  %v2223_v44 = vmul.f32 -1.442695, %v263_v41 }
  0xd6   :  { %2585 = vpow2.f32 %v2223_v44 }
  0xe1   :  { %v2584_v42 = vpop.eup %2583 }
  0xe2   :  { %277 = vrot.lane.b32.xlu0 %v2584_v42, %s2778_s24 }
  0xe3   :  { %v2586_v45 = vpop.eup %2585 }
  0xe4   :  { %v267_v46 = vadd.f32 1.0, %v2586_v45 }
  0xe6   :  { %272 = vrot.lane.b32.xlu0 %v189_v43, %s2778_s24  ;;  %2587 = vrcp.f32 %v267_v46 }
  0xf3   :  { %v2588_v47 = vpop.eup %2587 }
 0x154   :  { %v278_v48 = vpop.permute.xlu0 %277 }
 0x155   :  { %v280_v49 = vmul.f32 %v2588_v47, %v278_v48 }
 0x157   :  { %282 = vrot.lane.b32.xlu1 %v280_v49, %s2778_s24 }
 0x158   :  { %v273_v50 = vpop.permute.xlu0 %272 }
 0x159   :  { %v275_v51 = vmul.f32 %v2588_v47, %v273_v50 }
 0x1c9   :  { %v283_v52 = vpop.permute.xlu1 %282 }
 0x1ca   :  { %v285_v53 = vadd.f32 %v283_v52, %v275_v51 }
 0x1cc   :  { %2589 = vtanh.f32 %v285_v53  ;;  %v379_v8 = vrot.slane %v285_v53, 6 }
 0x1d9   :  { %v2590_v54 = vpop.eup %2589 }
 0x1da   :  { %288 = vrot.lane.b32.xlu1 %v2590_v54, %s2778_s24 }
 0x24c   :  { %v289_v55 = vpop.permute.xlu1 %288 }
 0x24d   :  { %v2970_v56 = vmul.f32 %v2588_v47, %v289_v55 }
 0x24f   :  { %293 = vrot.lane.b32.xlu0 %v2970_v56, %s2779_s5 }
 0x2c1   :  { %v294_v57 = vpop.permute.xlu0 %293 }
 0x2c2   :  { %2395 = vmatmul.mubr.msk.f32.vlgmr.msra.gmra.mxu0 %vm104_vm0, %v294_v57 }
 0x2c3   :  { %2409 = vmatpush3.msra.mxu0 %v2864_v2  ;;  %2416 = vmatprep.mubr.msk.f32.mxu0 %vm2777_vm1, %v2775_v4 }
 0x2c4   :  { %2410 = vmatprep.subr.mxu0 %v2775_v4 }
 0x2c5   :  { %2411 = vmatpush3.msra.mxu0 %v2873_v6 }
 0x2c6   :  { %2412 = vmatprep.subr.mxu0 %v2775_v4 }
 0x2c7   :  { %2413 = vmatpush3.msra.mxu0 %v2895_v17 }
 0x2c8   :  { %2414 = vmatprep.subr.mxu0 %v2775_v4 }
 0x2c9   :  { %2415 = vmatpush3.msra.mxu0 %v2917_v26 }
 0x2ca   :  { %2430 = vmatprep.subr.mxu0 %v2775_v4 }
 0x382   :  { %v363_v58 = vpop.f32.mrf.mxu0 }
 0x383   :  { %v368_v59 = vrot.slane %v363_v58, 6 }
 0x384   :  { %v2396_v60 = vpop.f32.mrf.mxu0 }
 0x385   :  { %v370_v61 = vadd.f32 %v368_v59, %v2960_v40 }
 0x387   :  { %2591 = vtanh.f32 %v370_v61  ;;  %v2225_v63 = vmul.f32 -1.442695, %v370_v61 }
 0x389   :  { %2593 = vpow2.f32 %v2225_v63 }
 0x394   :  { %v2592_v62 = vpop.eup %2591 }
 0x395   :  { %383 = vrot.lane.b32.xlu1 %v2592_v62, %s2778_s24 }
 0x396   :  { %v2594_v0 = vpop.eup %2593 }
 0x397   :  { %v374_v1 = vadd.f32 1.0, %v2594_v0 }
 0x399   :  { %2595 = vrcp.f32 %v374_v1 }
 0x3a6   :  { %v2596_v3 = vpop.eup %2595 }
 0x3a7   :  { %v381_v9 = vmul.f32 %v2596_v3, %v379_v8 }
 0x407   :  { %v384_v5 = vpop.permute.xlu1 %383 }
 0x408   :  { %v386_v7 = vmul.f32 %v2596_v3, %v384_v5 }
 0x40a   :  { %388 = vrot.lane.b32.xlu0 %v386_v7, %s2778_s24 }
 0x47c   :  { %v389_v10 = vpop.permute.xlu0 %388 }
 0x47d   :  { %v391_v11 = vadd.f32 %v389_v10, %v381_v9 }
 0x47f   :  { %2597 = vtanh.f32 %v391_v11  ;;  %v486_v31 = vrot.slane %v391_v11, 6 }
 0x48c   :  { %v2598_v12 = vpop.eup %2597 }
 0x48d   :  { %394 = vrot.lane.b32.xlu1 %v2598_v12, %s2778_s24 }
 0x4ff   :  { %v395_v13 = vpop.permute.xlu1 %394 }
 0x500   :  { %v397_v14 = vmul.f32 %v2596_v3, %v395_v13 }
 0x502   :  { %v399_v15 = vrot.slane %v397_v14, 2  ;;  %v1048_v39 = vsel %vm1047_vm2, %v2970_v56, %v397_v14 }
 0x504   :  { %400 = vrot.lane.b32.xlu0 %v399_v15, %s2779_s5 }
 0x576   :  { %v401_v16 = vpop.permute.xlu0 %400 }
 0x577   :  { %2406 = vmatmul.mubr.msk.f32.vlgmr.msra.gmra.mxu1 %vm104_vm0, %v401_v16 }
 0x578   :  { %2420 = vmatpush3.msra.mxu1 %v2864_v2  ;;  %2427 = vmatprep.mubr.msk.f32.mxu1 %vm2777_vm1, %v2775_v4 }
 0x579   :  { %2421 = vmatprep.subr.mxu1 %v2775_v4 }
 0x57a   :  { %2422 = vmatpush3.msra.mxu1 %v2873_v6 }
 0x57b   :  { %2423 = vmatprep.subr.mxu1 %v2775_v4 }
 0x57c   :  { %2424 = vmatpush3.msra.mxu1 %v2895_v17 }
 0x57d   :  { %2425 = vmatprep.subr.mxu1 %v2775_v4 }
 0x57e   :  { %2426 = vmatpush3.msra.mxu1 %v2917_v26 }
 0x57f   :  { %2441 = vmatprep.subr.mxu1 %v2775_v4 }
 0x637   :  { %v470_v18 = vpop.f32.mrf.mxu1 }
 0x638   :  { %v475_v19 = vrot.slane %v470_v18, 4 }
 0x639   :  { %v2407_v20 = vpop.f32.mrf.mxu1 }
 0x63a   :  { %v477_v21 = vadd.f32 %v475_v19, %v2960_v40 }
 0x63c   :  { %2599 = vtanh.f32 %v477_v21  ;;  %v2227_v24 = vmul.f32 -1.442695, %v477_v21 }
 0x63e   :  { %2601 = vpow2.f32 %v2227_v24 }
 0x649   :  { %v2600_v22 = vpop.eup %2599 }
 0x64a   :  { %490 = vrot.lane.b32.xlu1 %v2600_v22, %s2778_s24 }
 0x64b   :  { %v2602_v25 = vpop.eup %2601 }
 0x64c   :  { %v481_v27 = vadd.f32 1.0, %v2602_v25 }
 0x64e   :  { %2603 = vrcp.f32 %v481_v27 }
 0x65b   :  { %v2604_v28 = vpop.eup %2603 }
 0x65c   :  { %v488_v32 = vmul.f32 %v2604_v28, %v486_v31 }
 0x6bc   :  { %v491_v29 = vpop.permute.xlu1 %490 }
 0x6bd   :  { %v493_v30 = vmul.f32 %v2604_v28, %v491_v29 }
 0x6bf   :  { %495 = vrot.lane.b32.xlu0 %v493_v30, %s2778_s24 }
 0x731   :  { %v496_v33 = vpop.permute.xlu0 %495 }
 0x732   :  { %v498_v34 = vadd.f32 %v496_v33, %v488_v32 }
 0x734   :  { %2605 = vtanh.f32 %v498_v34  ;;  %v593_v55 = vrot.slane %v498_v34, 6 }
 0x741   :  { %v2606_v35 = vpop.eup %2605 }
 0x742   :  { %501 = vrot.lane.b32.xlu1 %v2606_v35, %s2778_s24 }
 0x7b4   :  { %v502_v36 = vpop.permute.xlu1 %501 }
 0x7b5   :  { %v504_v37 = vmul.f32 %v2604_v28, %v502_v36 }
 0x7b7   :  { %v506_v41 = vrot.slane %v504_v37, 4  ;;  %v1050_v42 = vsel %vm1049_vm3, %v1048_v39, %v504_v37 }
 0x7b9   :  { %507 = vrot.lane.b32.xlu0 %v506_v41, %s2779_s5 }
 0x82b   :  { %v508_v43 = vpop.permute.xlu0 %507 }
 0x82c   :  { %2417 = vmatmul.mubr.msk.f32.vlgmr.msra.gmra.mxu0 %vm104_vm0, %v508_v43 }
 0x82d   :  { %2431 = vmatpush3.msra.mxu0 %v2864_v2  ;;  %2438 = vmatprep.mubr.msk.f32.mxu0 %vm2777_vm1, %v2775_v4 }
 0x82e   :  { %2432 = vmatprep.subr.mxu0 %v2775_v4 }
 0x82f   :  { %2433 = vmatpush3.msra.mxu0 %v2873_v6 }
 0x830   :  { %2434 = vmatprep.subr.mxu0 %v2775_v4 }
 0x831   :  { %2435 = vmatpush3.msra.mxu0 %v2895_v17 }
 0x832   :  { %2436 = vmatprep.subr.mxu0 %v2775_v4 }
 0x833   :  { %2437 = vmatpush3.msra.mxu0 %v2917_v26 }
 0x834   :  { %2452 = vmatprep.subr.mxu0 %v2775_v4 }
 0x8ec   :  { %v577_v44 = vpop.f32.mrf.mxu0 }
 0x8ed   :  { %v582_v45 = vrot.slane %v577_v44, 2 }
 0x8ee   :  { %v2418_v46 = vpop.f32.mrf.mxu0 }
 0x8ef   :  { %v584_v47 = vadd.f32 %v582_v45, %v2960_v40 }
 0x8f1   :  { %2607 = vtanh.f32 %v584_v47  ;;  %v2229_v49 = vmul.f32 -1.442695, %v584_v47 }
 0x8f3   :  { %2609 = vpow2.f32 %v2229_v49 }
 0x8fe   :  { %v2608_v48 = vpop.eup %2607 }
 0x8ff   :  { %597 = vrot.lane.b32.xlu1 %v2608_v48, %s2778_s24 }
 0x900   :  { %v2610_v50 = vpop.eup %2609 }
 0x901   :  { %v588_v51 = vadd.f32 1.0, %v2610_v50 }
 0x903   :  { %2611 = vrcp.f32 %v588_v51 }
 0x910   :  { %v2612_v52 = vpop.eup %2611 }
 0x911   :  { %v595_v56 = vmul.f32 %v2612_v52, %v593_v55 }
 0x971   :  { %v598_v53 = vpop.permute.xlu1 %597 }
 0x972   :  { %v600_v54 = vmul.f32 %v2612_v52, %v598_v53 }
 0x974   :  { %602 = vrot.lane.b32.xlu0 %v600_v54, %s2778_s24 }
 0x9e6   :  { %v603_v57 = vpop.permute.xlu0 %602 }
 0x9e7   :  { %v605_v58 = vadd.f32 %v603_v57, %v595_v56 }
 0x9e9   :  { %2613 = vtanh.f32 %v605_v58  ;;  %v697_v13 = vrot.slane %v605_v58, 6 }
 0x9f6   :  { %v2614_v40 = vpop.eup %2613 }
 0x9f7   :  { %608 = vrot.lane.b32.xlu1 %v2614_v40, %s2778_s24 }
 0xa69   :  { %v609_v59 = vpop.permute.xlu1 %608 }
 0xa6a   :  { %v611_v60 = vmul.f32 %v2612_v52, %v609_v59 }
 0xa6c   :  { %v613_v61 = vrot.slane %v611_v60, 6  ;;  %v3025_v62 = vsel %vm1051_vm4, %v1050_v42, %v611_v60 }
 0xa6e   :  { %614 = vrot.lane.b32.xlu0 %v613_v61, %s2779_s5 }
 0xae0   :  { %v615_v63 = vpop.permute.xlu0 %614 }
 0xae1   :  { %2428 = vmatmul.mubr.msk.f32.vlgmr.msra.gmra.mxu1 %vm104_vm0, %v615_v63 }
 0xae2   :  { %2442 = vmatpush3.msra.mxu1 %v2864_v2  ;;  %2449 = vmatprep.mubr.msk.f32.mxu1 %vm2777_vm1, %v2775_v4 }
 0xae3   :  { %2443 = vmatprep.subr.mxu1 %v2775_v4 }
 0xae4   :  { %2444 = vmatpush3.msra.mxu1 %v2873_v6 }
 0xae5   :  { %2445 = vmatprep.subr.mxu1 %v2775_v4 }
 0xae6   :  { %2446 = vmatpush3.msra.mxu1 %v2895_v17 }
 0xae7   :  { %2447 = vmatprep.subr.mxu1 %v2775_v4 }
 0xae8   :  { %2448 = vmatpush3.msra.mxu1 %v2917_v26 }
 0xba1   :  { %v684_v0 = vpop.f32.mrf.mxu1 }
 0xba2   :  { %v688_v1 = vadd.f32 %v684_v0, %v2958_v38 }
 0xba3   :  { %v2429_v3 = vpop.f32.mrf.mxu1 }
 0xba4   :  { %2615 = vtanh.f32 %v688_v1  ;;  %v2231_v7 = vmul.f32 -1.442695, %v688_v1 }
 0xba6   :  { %2617 = vpow2.f32 %v2231_v7 }
 0xbb1   :  { %v2616_v5 = vpop.eup %2615 }
 0xbb2   :  { %701 = vrot.lane.b32.xlu1 %v2616_v5, %s2778_s24 }
 0xbb3   :  { %v2618_v8 = vpop.eup %2617 }
 0xbb4   :  { %v692_v9 = vadd.f32 1.0, %v2618_v8 }
 0xbb6   :  { %2619 = vrcp.f32 %v692_v9 }
 0xbc3   :  { %v2620_v10 = vpop.eup %2619 }
 0xbc4   :  { %v699_v14 = vmul.f32 %v2620_v10, %v697_v13 }
 0xc24   :  { %v702_v11 = vpop.permute.xlu1 %701 }
 0xc25   :  { %v704_v12 = vmul.f32 %v2620_v10, %v702_v11 }
 0xc27   :  { %706 = vrot.lane.b32.xlu0 %v704_v12, %s2778_s24 }
 0xc99   :  { %v707_v15 = vpop.permute.xlu0 %706 }
 0xc9a   :  { %v709_v16 = vadd.f32 %v707_v15, %v699_v14 }
 0xc9c   :  { %2621 = vtanh.f32 %v709_v16 }
 0xca9   :  { %v2622_v18 = vpop.eup %2621 }
 0xcaa   :  { %712 = vrot.lane.b32.xlu1 %v2622_v18, %s2778_s24 }
 0xd1c   :  { %v713_v19 = vpop.permute.xlu1 %712 }
 0xd1d   :  { %v3042_v20 = vmul.f32 %v2620_v10, %v713_v19  ;;  %v1059_v19 = vld [vmem:[%s3337_s6 + $0x18] sm:$0xff] }
 0xd1e   :  { %2463 = vmatprep.subr.mxu1 %v1059_v19 }
 0xd1f   :  { %717 = vrot.lane.b32.xlu0 %v3042_v20, %s2779_s5 }
 0xd91   :  { %v718_v21 = vpop.permute.xlu0 %717 }
 0xd92   :  { %2439 = vmatmul.mubr.msk.f32.vlgmr.msra.gmra.mxu0 %vm104_vm0, %v718_v21  ;;  %v3100_v21 = vld [vmem:[%s3338_s7 + $0x10] sm:$0xff] }
 0xd93   :  { %2453 = vmatpush3.msra.mxu0 %v2864_v2  ;;  %2460 = vmatprep.mubr.msk.f32.mxu0 %vm2777_vm1, %v2775_v4 }
 0xd94   :  { %2454 = vmatprep.subr.mxu0 %v2775_v4 }
 0xd95   :  { %2455 = vmatpush3.msra.mxu0 %v2873_v6 }
 0xd96   :  { %2456 = vmatprep.subr.mxu0 %v2775_v4 }
 0xd97   :  { %2457 = vmatpush3.msra.mxu0 %v2895_v17 }
 0xd98   :  { %2458 = vmatprep.subr.mxu0 %v2775_v4 }
 0xd99   :  { %2459 = vmatpush3.msra.mxu0 %v2917_v26  ;;  %v803_v26 = vrot.slane %v709_v16, 6 }
 0xd9a   :  { %2474 = vmatprep.subr.mxu0 %v2775_v4 }
 0xe52   :  { %v787_v22 = vpop.f32.mrf.mxu0 }
 0xe53   :  { %v792_v24 = vrot.slane %v787_v22, 6  ;;  %v1057_v22 = vld [vmem:[%s3337_s6 + $0x8] sm:$0xff] }
 0xe54   :  { %v2440_v2 = vpop.f32.mrf.mxu0 }
 0xe55   :  { %v794_v25 = vadd.f32 %v792_v24, %v2958_v38  ;;  %v3109_v24 = vld [vmem:[%s3338_s7 + $0x8] sm:$0xff]  ;;  %v1056_v2 = vld [vmem:[%s3337_s6] sm:$0xff] }
 0xe57   :  { %2623 = vtanh.f32 %v794_v25  ;;  %v2233_v6 = vmul.f32 -1.442695, %v794_v25 }
 0xe59   :  { %2625 = vpow2.f32 %v2233_v6  ;;  %v2241_v6 = vld [vmem:[%s3332_s1 + $0x2] sm:$0x3] }
 0xe64   :  { %v2624_v27 = vpop.eup %2623 }
 0xe65   :  { %807 = vrot.lane.b32.xlu1 %v2624_v27, %s2778_s24  ;;  %v3123_v27 = vld [vmem:[%s3338_s7] sm:$0xff] }
 0xe66   :  { %v2626_v28 = vpop.eup %2625 }
 0xe67   :  { %v798_v29 = vadd.f32 1.0, %v2626_v28 }
 0xe69   :  { %2627 = vrcp.f32 %v798_v29 }
 0xe76   :  { %v2628_v17 = vpop.eup %2627 }
 0xe77   :  { %v805_v32 = vmul.f32 %v2628_v17, %v803_v26 }
 0xed7   :  { %v808_v30 = vpop.permute.xlu1 %807 }
 0xed8   :  { %v810_v31 = vmul.f32 %v2628_v17, %v808_v30  ;;  %v2242_v30 = vld [vmem:[%s3333_s2 + $0x2] sm:$0x3] }
 0xeda   :  { %812 = vrot.lane.b32.xlu0 %v810_v31, %s2778_s24 }
 0xf4c   :  { %v813_v33 = vpop.permute.xlu0 %812 }
 0xf4d   :  { %v815_v34 = vadd.f32 %v813_v33, %v805_v32  ;;  %v2238_v33 = vld [vmem:[%s3339_s8] ss:$0 sm:$0xff]  ;;  %s2780_s8 = smov 96  }
 0xf4f   :  { %2629 = vtanh.f32 %v815_v34  ;;  %v910_v53 = vrot.slane %v815_v34, 6 }
 0xf5c   :  { %v2630_v35 = vpop.eup %2629 }
 0xf5d   :  { %818 = vrot.lane.b32.xlu1 %v2630_v35, %s2778_s24 }
 0xfcf   :  { %v819_v36 = vpop.permute.xlu1 %818 }
 0xfd0   :  { %v821_v37 = vmul.f32 %v2628_v17, %v819_v36 }
 0xfd2   :  { %v823_v39 = vrot.slane %v821_v37, 2  ;;  %v1053_v59 = vsel %vm1047_vm2, %v3042_v20, %v821_v37  ;;  %v1058_v20 = vld [vmem:[%s3337_s6 + $0x10] sm:$0xff] }
 0xfd4   :  { %824 = vrot.lane.b32.xlu0 %v823_v39, %s2779_s5 }
0x1046   :  { %v825_v41 = vpop.permute.xlu0 %824 }
0x1047   :  { %2450 = vmatmul.mubr.msk.f32.vlgmr.msra.gmra.mxu1 %vm104_vm0, %v825_v41 }
0x1048   :  { %2464 = vmatpush3.msra.mxu1 %v1059_v19 }
0x1049   :  { %2465 = vmatprep.subr.mxu1 %v1058_v20 }
0x104a   :  { %2466 = vmatpush3.msra.mxu1 %v1058_v20 }
0x104b   :  { %2467 = vmatprep.subr.mxu1 %v1057_v22 }
0x104c   :  { %2468 = vmatpush3.msra.mxu1 %v1057_v22 }
0x104d   :  { %2469 = vmatprep.subr.mxu1 %v1056_v2 }
0x104e   :  { %2470 = vmatpush3.msra.mxu1 %v1056_v2 }
0x104f   :  { %2485 = vmatprep.subr.mxu1 %v2775_v4 }
0x1107   :  { %v894_v42 = vpop.f32.mrf.mxu1 }
0x1108   :  { %v899_v43 = vrot.slane %v894_v42, 4 }
0x1109   :  { %v2451_v44 = vpop.f32.mrf.mxu1 }
0x110a   :  { %v901_v45 = vadd.f32 %v899_v43, %v2958_v38 }
0x110c   :  { %2631 = vtanh.f32 %v901_v45  ;;  %v2235_v47 = vmul.f32 -1.442695, %v901_v45 }
0x110e   :  { %2633 = vpow2.f32 %v2235_v47 }
0x1119   :  { %v2632_v46 = vpop.eup %2631 }
0x111a   :  { %914 = vrot.lane.b32.xlu1 %v2632_v46, %s2778_s24 }
0x111b   :  { %v2634_v48 = vpop.eup %2633 }
0x111c   :  { %v905_v49 = vadd.f32 1.0, %v2634_v48 }
0x111e   :  { %2635 = vrcp.f32 %v905_v49 }
0x112b   :  { %v2636_v50 = vpop.eup %2635 }
0x112c   :  { %v912_v54 = vmul.f32 %v2636_v50, %v910_v53 }
0x118c   :  { %v915_v51 = vpop.permute.xlu1 %914 }
0x118d   :  { %v917_v52 = vmul.f32 %v2636_v50, %v915_v51 }
0x118f   :  { %919 = vrot.lane.b32.xlu0 %v917_v52, %s2778_s24 }
0x1201   :  { %v920_v55 = vpop.permute.xlu0 %919 }
0x1202   :  { %v922_v56 = vadd.f32 %v920_v55, %v912_v54 }
0x1204   :  { %2637 = vtanh.f32 %v922_v56  ;;  %v1017_v14 = vrot.slane %v922_v56, 6 }
0x1211   :  { %v2638_v57 = vpop.eup %2637 }
0x1212   :  { %925 = vrot.lane.b32.xlu1 %v2638_v57, %s2778_s24 }
0x1284   :  { %v926_v58 = vpop.permute.xlu1 %925 }
0x1285   :  { %v928_v40 = vmul.f32 %v2636_v50, %v926_v58 }
0x1287   :  { %v930_v60 = vrot.slane %v928_v40, 4  ;;  %v3070_v61 = vsel %vm1049_vm3, %v1053_v59, %v928_v40 }
0x1289   :  { %931 = vrot.lane.b32.xlu0 %v930_v60, %s2779_s5 }
0x12fb   :  { %v932_v63 = vpop.permute.xlu0 %931 }
0x12fc   :  { %2461 = vmatmul.mubr.msk.f32.vlgmr.msra.gmra.mxu0 %vm104_vm0, %v932_v63 }
0x12fd   :  { %2482 = vmatprep.mubr.msk.f32.mxu0 %vm2777_vm1, %v2775_v4 }
0x13bc   :  { %v1001_v0 = vpop.f32.mrf.mxu0 }
0x13bd   :  { %v1006_v1 = vrot.slane %v1001_v0, 2 }
0x13be   :  { %v2462_v3 = vpop.f32.mrf.mxu0 }
0x13bf   :  { %v1008_v5 = vadd.f32 %v1006_v1, %v2958_v38 }
0x13c1   :  { %2639 = vtanh.f32 %v1008_v5  ;;  %v2237_v8 = vmul.f32 -1.442695, %v1008_v5 }
0x13c3   :  { %2641 = vpow2.f32 %v2237_v8 }
0x13ce   :  { %v2640_v7 = vpop.eup %2639 }
0x13cf   :  { %1021 = vrot.lane.b32.xlu1 %v2640_v7, %s2778_s24 }
0x13d0   :  { %v2642_v9 = vpop.eup %2641 }
0x13d1   :  { %v1012_v10 = vadd.f32 1.0, %v2642_v9 }
0x13d3   :  { %2643 = vrcp.f32 %v1012_v10 }
0x13e0   :  { %v2644_v11 = vpop.eup %2643 }
0x13e1   :  { %v1019_v15 = vmul.f32 %v2644_v11, %v1017_v14 }
0x1441   :  { %v1022_v12 = vpop.permute.xlu1 %1021 }
0x1442   :  { %v1024_v13 = vmul.f32 %v2644_v11, %v1022_v12 }
0x1444   :  { %1026 = vrot.lane.b32.xlu0 %v1024_v13, %s2778_s24 }
0x1448   :  { %1069 = vrot.lane.b32.xlu0 %v3025_v62, %s2779_s5  ;;  %v3094_v62 = vld [vmem:[%s3338_s7 + $0x18] sm:$0xff] }
0x1449   :  { %2475 = vmatpush3.msra.mxu0 %v3094_v62 }
0x144a   :  { %2476 = vmatprep.subr.mxu0 %v2775_v4 }
0x144b   :  { %2477 = vmatpush3.msra.mxu0 %v3100_v21 }
0x144c   :  { %2478 = vmatprep.subr.mxu0 %v2775_v4 }
0x144d   :  { %2479 = vmatpush3.msra.mxu0 %v3109_v24 }
0x144e   :  { %2480 = vmatprep.subr.mxu0 %v2775_v4 }
0x144f   :  { %2481 = vmatpush3.msra.mxu0 %v3123_v27 }
0x1450   :  { %2483 = vmatmul.mubr.msk.f32.vlgmr.msra.gmra.mxu0 %vm104_vm0, %v2241_v6  ;;  %2496 = vmatprep.subr.mxu0 %v2775_v4 }
0x1451   :  { %2497 = vmatpush3.msra.mxu0 %v3094_v62  ;;  %2504 = vmatprep.mubr.msk.f32.mxu0 %vm2777_vm1, %v2775_v4 }
0x1452   :  { %2498 = vmatprep.subr.mxu0 %v2775_v4 }
0x1453   :  { %2499 = vmatpush3.msra.mxu0 %v3100_v21 }
0x1454   :  { %2500 = vmatprep.subr.mxu0 %v2775_v4 }
0x1455   :  { %2501 = vmatpush3.msra.mxu0 %v3109_v24 }
0x1456   :  { %2502 = vmatprep.subr.mxu0 %v2775_v4 }
0x1457   :  { %2503 = vmatpush3.msra.mxu0 %v3123_v27 }
0x1458   :  { %2518 = vmatprep.subr.mxu0 %v2775_v4 }
0x14b6   :  { %v1027_v38 = vpop.permute.xlu0 %1026 }
0x14b7   :  { %v3081_v16 = vadd.f32 %v1027_v38, %v1019_v15 }
0x14b9   :  { %2645 = vtanh.f32 %v3081_v16 }
0x14ba   :  { %v1070_v18 = vpop.permute.xlu0 %1069 }
0x14bb   :  { %2471 = vmatprep.mubr.msk.f32.mxu1 %vm104_vm0, %v1070_v18 }
0x14c6   :  { %v2646_v25 = vpop.eup %2645 }
0x14c7   :  { %1032 = vrot.lane.b32.xlu1 %v2646_v25, %s2778_s24 }
0x1510   :  { %v1229_v26 = vpop.f32.mrf.mxu0 }
0x1512   :  { %v2484_v32 = vpop.f32.mrf.mxu0 }
0x1539   :  { %v1033_v28 = vpop.permute.xlu1 %1032 }
0x153a   :  { %v3140_v29 = vmul.f32 %v2644_v11, %v1033_v28 }
0x153c   :  { %v1055_v17 = vsel %vm1051_vm4, %v3070_v61, %v3140_v29 }
0x153d   :  { %1071 = vrot.lane.b32.xlu1 %v1055_v17, %s2779_s5 }
0x1541   :  { %1242 = vrot.lane.b32.xlu1 %v2242_v30, %s2778_s24 }
0x15af   :  { %v1072_v31 = vpop.permute.xlu1 %1071 }
0x15b0   :  { %2472 = vmatmul.mubr.msk.f32.vlgmr.msra.gmra.mxu1 %vm104_vm0, %v1072_v31 }
0x15b1   :  { %2486 = vmatpush3.msra.mxu1 %v3094_v62  ;;  %2493 = vmatprep.mubr.msk.f32.mxu1 %vm2777_vm1, %v2775_v4 }
0x15b2   :  { %2487 = vmatprep.subr.mxu1 %v2775_v4 }
0x15b3   :  { %2488 = vmatpush3.msra.mxu1 %v3100_v21  ;;  %v1243_v48 = vpop.permute.xlu1 %1242 }
0x15b4   :  { %2489 = vmatprep.subr.mxu1 %v2775_v4 }
0x15b5   :  { %2490 = vmatpush3.msra.mxu1 %v3109_v24 }
0x15b6   :  { %2491 = vmatprep.subr.mxu1 %v2775_v4 }
0x15b7   :  { %2492 = vmatpush3.msra.mxu1 %v3123_v27 }
0x15b8   :  { %2507 = vmatprep.subr.mxu1 %v2775_v4 }
0x1670   :  { %v2473_v34 = vpop.f32.mrf.mxu1 }
0x1671   :  { %v3165_v35 = vadd.f32 %v2473_v34, %v2238_v33 }
0x1672   :  { %v1143_v36 = vpop.f32.mrf.mxu1 }
0x1673   :  { %v3167_v37 = vadd.f32 %v2238_v33, %v1143_v36 }
0x1675   :  { %v1233_v39 = vadd.f32 %v1229_v26, %v3167_v37 }
0x1677   :  { %2647 = vtanh.f32 %v1233_v39  ;;  %v2244_v42 = vmul.f32 -1.442695, %v1233_v39 }
0x1679   :  { %2649 = vpow2.f32 %v2244_v42 }
0x1684   :  { %v2648_v41 = vpop.eup %2647 }
0x1685   :  { %1247 = vrot.lane.b32.xlu0 %v2648_v41, %s2778_s24 }
0x1686   :  { %v2650_v43 = vpop.eup %2649 }
0x1687   :  { %v1237_v44 = vadd.f32 1.0, %v2650_v43 }
0x1689   :  { %2651 = vrcp.f32 %v1237_v44 }
0x1696   :  { %v2652_v45 = vpop.eup %2651 }
0x1697   :  { %v1245_v49 = vmul.f32 %v2652_v45, %v1243_v48 }
0x16f7   :  { %v1248_v46 = vpop.permute.xlu0 %1247 }
0x16f8   :  { %v1250_v47 = vmul.f32 %v2652_v45, %v1248_v46 }
0x16fa   :  { %1252 = vrot.lane.b32.xlu0 %v1250_v47, %s2778_s24 }
0x176c   :  { %v1253_v50 = vpop.permute.xlu0 %1252 }
0x176d   :  { %v1255_v51 = vadd.f32 %v1253_v50, %v1245_v49 }
0x176f   :  { %2653 = vtanh.f32 %v1255_v51  ;;  %v1349_v5 = vrot.slane %v1255_v51, 6 }
0x177c   :  { %v2654_v52 = vpop.eup %2653 }
0x177d   :  { %1258 = vrot.lane.b32.xlu1 %v2654_v52, %s2778_s24 }
0x17ef   :  { %v1259_v53 = vpop.permute.xlu1 %1258 }
0x17f0   :  { %v3173_v54 = vmul.f32 %v2652_v45, %v1259_v53 }
0x17f2   :  { %1263 = vrot.lane.b32.xlu0 %v3173_v54, %s2779_s5 }
0x1864   :  { %v1264_v55 = vpop.permute.xlu0 %1263 }
0x1865   :  { %2494 = vmatmul.mubr.msk.f32.vlgmr.msra.gmra.mxu1 %vm104_vm0, %v1264_v55 }
0x1866   :  { %2508 = vmatpush3.msra.mxu1 %v3094_v62  ;;  %2515 = vmatprep.mubr.msk.f32.mxu1 %vm2777_vm1, %v2775_v4 }
0x1867   :  { %2509 = vmatprep.subr.mxu1 %v2775_v4 }
0x1868   :  { %2510 = vmatpush3.msra.mxu1 %v3100_v21 }
0x1869   :  { %2511 = vmatprep.subr.mxu1 %v2775_v4 }
0x186a   :  { %2512 = vmatpush3.msra.mxu1 %v3109_v24 }
0x186b   :  { %2513 = vmatprep.subr.mxu1 %v2775_v4 }
0x186c   :  { %2514 = vmatpush3.msra.mxu1 %v3123_v27 }
0x186d   :  { %2529 = vmatprep.subr.mxu1 %v2775_v4 }
0x1925   :  { %v1333_v56 = vpop.f32.mrf.mxu1 }
0x1926   :  { %v1338_v57 = vrot.slane %v1333_v56, 6 }
0x1927   :  { %v2495_v58 = vpop.f32.mrf.mxu1 }
0x1928   :  { %v1340_v40 = vadd.f32 %v1338_v57, %v3167_v37 }
0x192a   :  { %2655 = vtanh.f32 %v1340_v40  ;;  %v2246_v60 = vmul.f32 -1.442695, %v1340_v40 }
0x192c   :  { %2657 = vpow2.f32 %v2246_v60 }
0x1937   :  { %v2656_v59 = vpop.eup %2655 }
0x1938   :  { %1353 = vrot.lane.b32.xlu1 %v2656_v59, %s2778_s24 }
0x1939   :  { %v2658_v61 = vpop.eup %2657 }
0x193a   :  { %v1344_v63 = vadd.f32 1.0, %v2658_v61 }
0x193c   :  { %2659 = vrcp.f32 %v1344_v63 }
0x1949   :  { %v2660_v0 = vpop.eup %2659 }
0x194a   :  { %v1351_v7 = vmul.f32 %v2660_v0, %v1349_v5 }
0x19aa   :  { %v1354_v1 = vpop.permute.xlu1 %1353 }
0x19ab   :  { %v1356_v3 = vmul.f32 %v2660_v0, %v1354_v1 }
0x19ad   :  { %1358 = vrot.lane.b32.xlu0 %v1356_v3, %s2778_s24 }
0x1a1f   :  { %v1359_v8 = vpop.permute.xlu0 %1358 }
0x1a20   :  { %v1361_v9 = vadd.f32 %v1359_v8, %v1351_v7 }
0x1a22   :  { %2661 = vtanh.f32 %v1361_v9  ;;  %v1456_v30 = vrot.slane %v1361_v9, 6 }
0x1a2f   :  { %v2662_v10 = vpop.eup %2661 }
0x1a30   :  { %1364 = vrot.lane.b32.xlu1 %v2662_v10, %s2778_s24 }
0x1aa2   :  { %v1365_v11 = vpop.permute.xlu1 %1364 }
0x1aa3   :  { %v1367_v12 = vmul.f32 %v2660_v0, %v1365_v11 }
0x1aa5   :  { %v1369_v13 = vrot.slane %v1367_v12, 2  ;;  %v2018_v39 = vsel %vm1047_vm2, %v3173_v54, %v1367_v12 }
0x1aa7   :  { %1370 = vrot.lane.b32.xlu0 %v1369_v13, %s2779_s5 }
0x1b19   :  { %v1371_v14 = vpop.permute.xlu0 %1370 }
0x1b1a   :  { %2505 = vmatmul.mubr.msk.f32.vlgmr.msra.gmra.mxu0 %vm104_vm0, %v1371_v14 }
0x1b1b   :  { %2519 = vmatpush3.msra.mxu0 %v3094_v62  ;;  %2526 = vmatprep.mubr.msk.f32.mxu0 %vm2777_vm1, %v2775_v4 }
0x1b1c   :  { %2520 = vmatprep.subr.mxu0 %v2775_v4 }
0x1b1d   :  { %2521 = vmatpush3.msra.mxu0 %v3100_v21 }
0x1b1e   :  { %2522 = vmatprep.subr.mxu0 %v2775_v4 }
0x1b1f   :  { %2523 = vmatpush3.msra.mxu0 %v3109_v24 }
0x1b20   :  { %2524 = vmatprep.subr.mxu0 %v2775_v4 }
0x1b21   :  { %2525 = vmatpush3.msra.mxu0 %v3123_v27 }
0x1b22   :  { %2540 = vmatprep.subr.mxu0 %v2775_v4 }
0x1bda   :  { %v1440_v15 = vpop.f32.mrf.mxu0 }
0x1bdb   :  { %v1445_v38 = vrot.slane %v1440_v15, 4 }
0x1bdc   :  { %v2506_v18 = vpop.f32.mrf.mxu0 }
0x1bdd   :  { %v1447_v19 = vadd.f32 %v1445_v38, %v3167_v37 }
0x1bdf   :  { %2663 = vtanh.f32 %v1447_v19  ;;  %v2248_v22 = vmul.f32 -1.442695, %v1447_v19 }
0x1be1   :  { %2665 = vpow2.f32 %v2248_v22 }
0x1bec   :  { %v2664_v20 = vpop.eup %2663 }
0x1bed   :  { %1460 = vrot.lane.b32.xlu1 %v2664_v20, %s2778_s24 }
0x1bee   :  { %v2666_v2 = vpop.eup %2665 }
0x1bef   :  { %v1451_v25 = vadd.f32 1.0, %v2666_v2 }
0x1bf1   :  { %2667 = vrcp.f32 %v1451_v25 }
0x1bfe   :  { %v2668_v6 = vpop.eup %2667 }
0x1bff   :  { %v1458_v31 = vmul.f32 %v2668_v6, %v1456_v30 }
0x1c5f   :  { %v1461_v28 = vpop.permute.xlu1 %1460 }
0x1c60   :  { %v1463_v17 = vmul.f32 %v2668_v6, %v1461_v28 }
0x1c62   :  { %1465 = vrot.lane.b32.xlu0 %v1463_v17, %s2778_s24 }
0x1cd4   :  { %v1466_v26 = vpop.permute.xlu0 %1465 }
0x1cd5   :  { %v1468_v32 = vadd.f32 %v1466_v26, %v1458_v31 }
0x1cd7   :  { %2669 = vtanh.f32 %v1468_v32  ;;  %v1563_v55 = vrot.slane %v1468_v32, 6 }
0x1ce4   :  { %v2670_v33 = vpop.eup %2669 }
0x1ce5   :  { %1471 = vrot.lane.b32.xlu1 %v2670_v33, %s2778_s24 }
0x1d57   :  { %v1472_v34 = vpop.permute.xlu1 %1471 }
0x1d58   :  { %v1474_v36 = vmul.f32 %v2668_v6, %v1472_v34 }
0x1d5a   :  { %v1476_v41 = vrot.slane %v1474_v36, 4  ;;  %v2019_v42 = vsel %vm1049_vm3, %v2018_v39, %v1474_v36 }
0x1d5c   :  { %1477 = vrot.lane.b32.xlu0 %v1476_v41, %s2779_s5 }
0x1dce   :  { %v1478_v43 = vpop.permute.xlu0 %1477 }
0x1dcf   :  { %2516 = vmatmul.mubr.msk.f32.vlgmr.msra.gmra.mxu1 %vm104_vm0, %v1478_v43 }
0x1dd0   :  { %2530 = vmatpush3.msra.mxu1 %v3094_v62  ;;  %2537 = vmatprep.mubr.msk.f32.mxu1 %vm2777_vm1, %v2775_v4 }
0x1dd1   :  { %2531 = vmatprep.subr.mxu1 %v2775_v4 }
0x1dd2   :  { %2532 = vmatpush3.msra.mxu1 %v3100_v21 }
0x1dd3   :  { %2533 = vmatprep.subr.mxu1 %v2775_v4 }
0x1dd4   :  { %2534 = vmatpush3.msra.mxu1 %v3109_v24 }
0x1dd5   :  { %2535 = vmatprep.subr.mxu1 %v2775_v4 }
0x1dd6   :  { %2536 = vmatpush3.msra.mxu1 %v3123_v27 }
0x1dd7   :  { %2551 = vmatprep.subr.mxu1 %v2775_v4 }
0x1e8f   :  { %v1547_v44 = vpop.f32.mrf.mxu1 }
0x1e90   :  { %v1552_v45 = vrot.slane %v1547_v44, 2 }
0x1e91   :  { %v2517_v46 = vpop.f32.mrf.mxu1 }
0x1e92   :  { %v1554_v47 = vadd.f32 %v1552_v45, %v3167_v37 }
0x1e94   :  { %2671 = vtanh.f32 %v1554_v47  ;;  %v2250_v49 = vmul.f32 -1.442695, %v1554_v47 }
0x1e96   :  { %2673 = vpow2.f32 %v2250_v49 }
0x1ea1   :  { %v2672_v48 = vpop.eup %2671 }
0x1ea2   :  { %1567 = vrot.lane.b32.xlu1 %v2672_v48, %s2778_s24 }
0x1ea3   :  { %v2674_v50 = vpop.eup %2673 }
0x1ea4   :  { %v1558_v51 = vadd.f32 1.0, %v2674_v50 }
0x1ea6   :  { %2675 = vrcp.f32 %v1558_v51 }
0x1eb3   :  { %v2676_v52 = vpop.eup %2675 }
0x1eb4   :  { %v1565_v56 = vmul.f32 %v2676_v52, %v1563_v55 }
0x1f14   :  { %v1568_v53 = vpop.permute.xlu1 %1567 }
0x1f15   :  { %v1570_v54 = vmul.f32 %v2676_v52, %v1568_v53 }
0x1f17   :  { %1572 = vrot.lane.b32.xlu0 %v1570_v54, %s2778_s24 }
0x1f89   :  { %v1573_v57 = vpop.permute.xlu0 %1572 }
0x1f8a   :  { %v1575_v58 = vadd.f32 %v1573_v57, %v1565_v56 }
0x1f8c   :  { %2677 = vtanh.f32 %v1575_v58  ;;  %v1667_v13 = vrot.slane %v1575_v58, 6 }
0x1f99   :  { %v2678_v37 = vpop.eup %2677 }
0x1f9a   :  { %1578 = vrot.lane.b32.xlu1 %v2678_v37, %s2778_s24 }
0x200c   :  { %v1579_v40 = vpop.permute.xlu1 %1578 }
0x200d   :  { %v1581_v59 = vmul.f32 %v2676_v52, %v1579_v40 }
0x200f   :  { %v1583_v60 = vrot.slane %v1581_v59, 6  ;;  %v3228_v61 = vsel %vm1051_vm4, %v2019_v42, %v1581_v59 }
0x2011   :  { %1584 = vrot.lane.b32.xlu0 %v1583_v60, %s2779_s5 }
0x2083   :  { %v1585_v63 = vpop.permute.xlu0 %1584 }
0x2084   :  { %2527 = vmatmul.mubr.msk.f32.vlgmr.msra.gmra.mxu0 %vm104_vm0, %v1585_v63 }
0x2085   :  { %2541 = vmatpush3.msra.mxu0 %v3094_v62  ;;  %2548 = vmatprep.mubr.msk.f32.mxu0 %vm2777_vm1, %v2775_v4 }
0x2086   :  { %2542 = vmatprep.subr.mxu0 %v2775_v4 }
0x2087   :  { %2543 = vmatpush3.msra.mxu0 %v3100_v21 }
0x2088   :  { %2544 = vmatprep.subr.mxu0 %v2775_v4 }
0x2089   :  { %2545 = vmatpush3.msra.mxu0 %v3109_v24 }
0x208a   :  { %2546 = vmatprep.subr.mxu0 %v2775_v4 }
0x208b   :  { %2547 = vmatpush3.msra.mxu0 %v3123_v27 }
0x2144   :  { %v1654_v0 = vpop.f32.mrf.mxu0 }
0x2145   :  { %v1658_v1 = vadd.f32 %v1654_v0, %v3165_v35 }
0x2146   :  { %v2528_v3 = vpop.f32.mrf.mxu0 }
0x2147   :  { %2679 = vtanh.f32 %v1658_v1  ;;  %v2252_v7 = vmul.f32 -1.442695, %v1658_v1 }
0x2149   :  { %2681 = vpow2.f32 %v2252_v7 }
0x2154   :  { %v2680_v5 = vpop.eup %2679 }
0x2155   :  { %1671 = vrot.lane.b32.xlu1 %v2680_v5, %s2778_s24 }
0x2156   :  { %v2682_v8 = vpop.eup %2681 }
0x2157   :  { %v1662_v9 = vadd.f32 1.0, %v2682_v8 }
0x2159   :  { %2683 = vrcp.f32 %v1662_v9 }
0x2166   :  { %v2684_v10 = vpop.eup %2683 }
0x2167   :  { %v1669_v14 = vmul.f32 %v2684_v10, %v1667_v13 }
0x21c7   :  { %v1672_v11 = vpop.permute.xlu1 %1671 }
0x21c8   :  { %v1674_v12 = vmul.f32 %v2684_v10, %v1672_v11 }
0x21ca   :  { %1676 = vrot.lane.b32.xlu0 %v1674_v12, %s2778_s24 }
0x223c   :  { %v1677_v15 = vpop.permute.xlu0 %1676 }
0x223d   :  { %v1679_v38 = vadd.f32 %v1677_v15, %v1669_v14 }
0x223f   :  { %2685 = vtanh.f32 %v1679_v38 }
0x224c   :  { %v2686_v18 = vpop.eup %2685 }
0x224d   :  { %1682 = vrot.lane.b32.xlu1 %v2686_v18, %s2778_s24 }
0x22bf   :  { %v1683_v19 = vpop.permute.xlu1 %1682 }
0x22c0   :  { %v3245_v20 = vmul.f32 %v2684_v10, %v1683_v19 }
0x22c2   :  { %1687 = vrot.lane.b32.xlu0 %v3245_v20, %s2779_s5 }
0x2334   :  { %v1688_v22 = vpop.permute.xlu0 %1687 }
0x2335   :  { %2538 = vmatmul.mubr.msk.f32.vlgmr.msra.gmra.mxu1 %vm104_vm0, %v1688_v22 }
0x2336   :  { %2552 = vmatpush3.msra.mxu1 %v3094_v62  ;;  %2559 = vmatprep.mubr.msk.f32.mxu1 %vm2777_vm1, %v2775_v4 }
0x2337   :  { %2553 = vmatprep.subr.mxu1 %v2775_v4 }
0x2338   :  { %2554 = vmatpush3.msra.mxu1 %v3100_v21 }
0x2339   :  { %2555 = vmatprep.subr.mxu1 %v2775_v4 }
0x233a   :  { %2556 = vmatpush3.msra.mxu1 %v3109_v24 }
0x233b   :  { %2557 = vmatprep.subr.mxu1 %v2775_v4  ;;  %v1773_v4 = vrot.slane %v1679_v38, 6 }
0x233c   :  { %2558 = vmatpush3.msra.mxu1 %v3123_v27 }
0x23f5   :  { %v1757_v2 = vpop.f32.mrf.mxu1 }
0x23f6   :  { %v1762_v25 = vrot.slane %v1757_v2, 6  ;;  %v2025_v2 = vld [vmem:[%s3340_s9 + $0x8] sm:$0xff] }
0x23f7   :  { %v2539_v6 = vpop.f32.mrf.mxu1 }
0x23f8   :  { %v1764_v62 = vadd.f32 %v1762_v25, %v3165_v35  ;;  %v2024_v25 = vld [vmem:[%s3340_s9] sm:$0xff] }
0x23fa   :  { %2687 = vtanh.f32 %v1764_v62  ;;  %v2254_v17 = vmul.f32 -1.442695, %v1764_v62 }
0x23fc   :  { %2689 = vpow2.f32 %v2254_v17 }
0x2407   :  { %v2688_v28 = vpop.eup %2687 }
0x2408   :  { %1777 = vrot.lane.b32.xlu1 %v2688_v28, %s2778_s24 }
0x2409   :  { %v2690_v21 = vpop.eup %2689 }
0x240a   :  { %v1768_v30 = vadd.f32 1.0, %v2690_v21 }
0x240c   :  { %2691 = vrcp.f32 %v1768_v30 }
0x2419   :  { %v2692_v31 = vpop.eup %2691 }
0x241a   :  { %v1775_v27 = vmul.f32 %v2692_v31, %v1773_v4 }
0x247a   :  { %v1778_v24 = vpop.permute.xlu1 %1777 }
0x247b   :  { %v1780_v26 = vmul.f32 %v2692_v31, %v1778_v24 }
0x247d   :  { %1782 = vrot.lane.b32.xlu0 %v1780_v26, %s2778_s24 }
0x24ef   :  { %v1783_v32 = vpop.permute.xlu0 %1782 }
0x24f0   :  { %v1785_v33 = vadd.f32 %v1783_v32, %v1775_v27 }
0x24f2   :  { %2693 = vtanh.f32 %v1785_v33  ;;  %v1880_v54 = vrot.slane %v1785_v33, 6 }
0x24ff   :  { %v2694_v34 = vpop.eup %2693 }
0x2500   :  { %1788 = vrot.lane.b32.xlu1 %v2694_v34, %s2778_s24 }
0x2572   :  { %v1789_v36 = vpop.permute.xlu1 %1788 }
0x2573   :  { %v1791_v39 = vmul.f32 %v2692_v31, %v1789_v36 }
0x2575   :  { %v1793_v41 = vrot.slane %v1791_v39, 2  ;;  %v2021_v59 = vsel %vm1047_vm2, %v3245_v20, %v1791_v39 }
0x2577   :  { %1794 = vrot.lane.b32.xlu0 %v1793_v41, %s2779_s5 }
0x25e9   :  { %v1795_v42 = vpop.permute.xlu0 %1794 }
0x25ea   :  { %2549 = vmatmul.mubr.msk.f32.vlgmr.msra.gmra.mxu0 %vm104_vm0, %v1795_v42 }
0x26aa   :  { %v1864_v43 = vpop.f32.mrf.mxu0 }
0x26ab   :  { %v1869_v44 = vrot.slane %v1864_v43, 4 }
0x26ac   :  { %v2550_v45 = vpop.f32.mrf.mxu0 }
0x26ad   :  { %v1871_v46 = vadd.f32 %v1869_v44, %v3165_v35 }
0x26af   :  { %2695 = vtanh.f32 %v1871_v46  ;;  %v2256_v48 = vmul.f32 -1.442695, %v1871_v46 }
0x26b1   :  { %2697 = vpow2.f32 %v2256_v48 }
0x26bc   :  { %v2696_v47 = vpop.eup %2695 }
0x26bd   :  { %1884 = vrot.lane.b32.xlu1 %v2696_v47, %s2778_s24 }
0x26be   :  { %v2698_v49 = vpop.eup %2697 }
0x26bf   :  { %v1875_v50 = vadd.f32 1.0, %v2698_v49 }
0x26c1   :  { %2699 = vrcp.f32 %v1875_v50 }
0x26ce   :  { %v2700_v51 = vpop.eup %2699 }
0x26cf   :  { %v1882_v55 = vmul.f32 %v2700_v51, %v1880_v54 }
0x272f   :  { %v1885_v52 = vpop.permute.xlu1 %1884 }
0x2730   :  { %v1887_v53 = vmul.f32 %v2700_v51, %v1885_v52 }
0x2732   :  { %1889 = vrot.lane.b32.xlu0 %v1887_v53, %s2778_s24 }
0x27a4   :  { %v1890_v56 = vpop.permute.xlu0 %1889 }
0x27a5   :  { %v1892_v57 = vadd.f32 %v1890_v56, %v1882_v55 }
0x27a7   :  { %2701 = vtanh.f32 %v1892_v57 }
0x27b4   :  { %v2702_v58 = vpop.eup %2701 }
0x27b5   :  { %1895 = vrot.lane.b32.xlu1 %v2702_v58, %s2778_s24 }
0x2827   :  { %v1896_v37 = vpop.permute.xlu1 %1895 }
0x2828   :  { %v1898_v40 = vmul.f32 %v2700_v51, %v1896_v37 }
0x282a   :  { %v1900_v60 = vrot.slane %v1898_v40, 4  ;;  %v2022_v63 = vsel %vm1049_vm3, %v2021_v59, %v1898_v40 }
0x282c   :  { %1901 = vrot.lane.b32.xlu0 %v1900_v60, %s2779_s5 }
0x289e   :  { %v1902_v0 = vpop.permute.xlu0 %1901 }
0x289f   :  { %2560 = vmatmul.mubr.msk.f32.vlgmr.msra.gmra.mxu1 %vm104_vm0, %v1902_v0 }
0x295f   :  { %v1971_v1 = vpop.f32.mrf.mxu1 }
0x2960   :  { %v1976_v3 = vrot.slane %v1971_v1, 2 }
0x2961   :  { %v2561_v5 = vpop.f32.mrf.mxu1 }
0x2962   :  { %v1978_v7 = vadd.f32 %v1976_v3, %v3165_v35  ;;  %v1987_v35 = vrot.slane %v1892_v57, 6 }
0x2964   :  { %2703 = vtanh.f32 %v1978_v7  ;;  %v2258_v9 = vmul.f32 -1.442695, %v1978_v7 }
0x2966   :  { %2705 = vpow2.f32 %v2258_v9 }
0x2971   :  { %v2704_v8 = vpop.eup %2703 }
0x2972   :  { %1991 = vrot.lane.b32.xlu1 %v2704_v8, %s2778_s24 }
0x2973   :  { %v2706_v10 = vpop.eup %2705 }
0x2974   :  { %v1982_v11 = vadd.f32 1.0, %v2706_v10 }
0x2976   :  { %2707 = vrcp.f32 %v1982_v11 }
0x2983   :  { %v2708_v12 = vpop.eup %2707 }
0x2984   :  { %v1989_v15 = vmul.f32 %v2708_v12, %v1987_v35 }
0x29e4   :  { %v1992_v13 = vpop.permute.xlu1 %1991 }
0x29e5   :  { %v1994_v14 = vmul.f32 %v2708_v12, %v1992_v13 }
0x29e7   :  { %1996 = vrot.lane.b32.xlu0 %v1994_v14, %s2778_s24 }
0x29eb   :  { %2037 = vrot.lane.b32.xlu0 %v3228_v61, %s2779_s5 }
0x29ef   :  { %1037 = vrot.lane.b32.xlu0 %v3140_v29, %s2779_s5  ;;  %v2027_v29 = vld [vmem:[%s3340_s9 + $0x18] sm:$0xff] }
0x29f0   :  { %2562 = vmatprep.subr.mxu0 %v2027_v29 }
0x29f1   :  { %2563 = vmatpush3.msra.mxu0 %v2027_v29 }
0x29f3   :  { %1043 = vrot.lane.b32.xlu0 %v3081_v16, %s2780_s8  ;;  %v2026_v16 = vld [vmem:[%s3340_s9 + $0x10] sm:$0xff]  ;;  %s2781_s9 = smov [#allocation4]  }
0x29f4   :  { %2564 = vmatprep.subr.mxu0 %v2026_v16  ;;  %s2189_s16 = sshll.u32 %s2781_s9, 4  ;;  %s2190_s16 = int_to_ptr.vmem [resolvable:$true] %s2189_s16 }
0x29f5   :  { %2565 = vmatpush3.msra.mxu0 %v2026_v16  ;;  %s2711_s17 = scalar_lea.vmem %s2190_s16, 64  ;;  %p2716_p1 = scmp.lt.s32.totalorder %s2190_s16, %s2190_s16 }
0x29f6   :  { %2566 = vmatprep.subr.mxu0 %v2025_v2  ;;  %p2712_p0 = scmp.ne.s32.totalorder %s2190_s16, %s2711_s17  ;;  %p2717_p2 = scmp.lt.s32.totalorder %s2711_s17, %s2711_s17 }
0x29f7   :  { %2567 = vmatpush3.msra.mxu0 %v2025_v2 }
0x29f8   :  { %2568 = vmatprep.subr.mxu0 %v2024_v25  ;;  %p2718_p3 = por %p2717_p2, %p2716_p1 }
0x29f9   :  { %2569 = vmatpush3.msra.mxu0 %v2024_v25 }
0x29fa   :  { %p2719_p4 = pnand %p2718_p3, %p2712_p0 }
0x2a59   :  { %v1997_v38 = vpop.permute.xlu0 %1996 }
0x2a5a   :  { %v1999_v18 = vadd.f32 %v1997_v38, %v1989_v15 }
0x2a5c   :  { %2709 = vtanh.f32 %v1999_v18 }
0x2a5d   :  { %v2038_v19 = vpop.permute.xlu0 %2037 }
0x2a5e   :  { %2570 = vmatprep.mubr.msk.f32.mxu0 %vm104_vm0, %v2038_v19 }
0x2a61   :  { %v1038_v20 = vpop.permute.xlu0 %1037 }
0x2a62   :  { %1041 = vst.msk [vmem:[#allocation4 - $0x6] sm:$0xc0] %vm1040_vm5, %v1038_v20 }
0x2a65   :  { %v1044_v61 = vpop.permute.xlu0 %1043 }
0x2a66   :  { %1046 = vst.msk [vmem:[#allocation6 - $0x6] sm:$0xc0] %vm1040_vm5, %v1044_v61 }
0x2a69   :  { %v2710_v22 = vpop.eup %2709 }
0x2a6a   :  { %2002 = vrot.lane.b32.xlu1 %v2710_v22, %s2778_s24 }
0x2adc   :  { %v2003_v6 = vpop.permute.xlu1 %2002 }
0x2add   :  { %v2005_v62 = vmul.f32 %v2708_v12, %v2003_v6 }
0x2adf   :  { %v2023_v28 = vsel %vm1051_vm4, %v2022_v63, %v2005_v62 }
0x2ae0   :  { %2039 = vrot.lane.b32.xlu1 %v2023_v28, %s2779_s5 }
0x2ae4   :  { %2007 = vrot.lane.b32.xlu1 %v2005_v62, %s2779_s5 }
0x2ae8   :  { %2013 = vrot.lane.b32.xlu1 %v1999_v18, %s2780_s8 }
0x2b52   :  { %v2040_v17 = vpop.permute.xlu1 %2039 }
0x2b53   :  { %2571 = vmatmul.mubr.msk.f32.vlgmr.msra.gmra.mxu0 %vm104_vm0, %v2040_v17 }
0x2b56   :  { %v2008_v21 = vpop.permute.xlu1 %2007 }
0x2b57   :  { %2011 = vst.msk [vmem:[#allocation4 - $0x4] sm:$0xc0] %vm1040_vm5, %v2008_v21 }
0x2b5a   :  { %v2014_v30 = vpop.permute.xlu1 %2013 }
0x2b5b   :  { %2017 = vst.msk [vmem:[#allocation6 - $0x4] sm:$0xc0] %vm1040_vm5, %v2014_v30 }
0x2b5c   :  { %2722 = shalt.err (!%p2719_p4)
}
0x2b5d   :  { %s2782_s5 = smov 2   ;;  %s2783_s20 = smov [#allocation6]  }
0x2b5e   :  { %2195 = dma.vmem_to_hbm [thread:$0]  %s2190_s16, 64, %s3343_s12, [#allocation5], %s2778_s24, %s2778_s24, %s2782_s5  }
0x2b5f   :  { %s2201_s21 = sshll.u32 %s2783_s20, 4  ;;  %s2202_s21 = int_to_ptr.vmem [resolvable:$true] %s2201_s21 }
0x2b60   :  { %s2731_s0 = scalar_lea.vmem %s2202_s21, 64  ;;  %p2736_p6 = scmp.lt.s32.totalorder %s2202_s21, %s2202_s21 }
0x2b61   :  { %p2732_p5 = scmp.ne.s32.totalorder %s2202_s21, %s2731_s0  ;;  %p2737_p7 = scmp.lt.s32.totalorder %s2731_s0, %s2731_s0 }
0x2b63   :  { %p2738_p8 = por %p2737_p7, %p2736_p6 }
0x2b65   :  { %p2739_p9 = pnand %p2738_p8, %p2732_p5 }
0x2b67   :  { %2742 = shalt.err (!%p2739_p9)
}
0x2b68   :  { %2207 = dma.vmem_to_hbm [thread:$0]  %s2202_s21, 64, %s3344_s13, [#allocation5], %s2778_s24, %s2778_s24, %s2782_s5  }
0x2b69   :  { %v2259_v31 = vld [vmem:[%s3341_s10] ss:$0 sm:$0xff]  ;;  %s2784_s12 = smov [#allocation2]  }
0x2b6a   :  { %s2177_s13 = sshll.u32 %s2784_s12, 4  ;;  %s2178_s13 = int_to_ptr.vmem [resolvable:$true] %s2177_s13 }
0x2b6b   :  { %s2751_s10 = scalar_lea.vmem %s2178_s13, 256  ;;  %p2756_p11 = scmp.lt.s32.totalorder %s2178_s13, %s2178_s13 }
0x2b6c   :  { %p2752_p10 = scmp.ne.s32.totalorder %s2178_s13, %s2751_s10  ;;  %p2757_p12 = scmp.lt.s32.totalorder %s2751_s10, %s2751_s10 }
0x2b6e   :  { %p2758_p13 = por %p2757_p12, %p2756_p11 }
0x2b70   :  { %p2759_p0 = pnand %p2758_p13, %p2752_p10 }
0x2c13   :  { %v2572_v24 = vpop.f32.mrf.mxu0 }
0x2c14   :  { %v2117_v26 = vadd.f32 %v2572_v24, %v2259_v31 }
0x2c15   :  { %v2111_v4 = vpop.f32.mrf.mxu0 }
0x2c16   :  { %v2139_v27 = vcombine.high %v2117_v26, %v2117_v26  ;;  %v2146_v32 = vrot.slane %v2117_v26, %v2911_v23  ;;  %2264 = vst.sshfl [vmem:[#allocation2 + $0x8] sm:$0x3 pattern:$0x76325410] %v2117_v26  ;;  %v2112_v33 = vadd.f32 %v2259_v31, %v2111_v4 }
0x2c18   :  { %v2153_v34 = vrot.slane %v2139_v27, %v2911_v23  ;;  %v2154_v36 = vcombine.high %v2146_v32, %v2146_v32  ;;  %2265 = vst.sshfl [vmem:[#allocation2 + $0xc] sm:$0x3 pattern:$0x76325410] %v2139_v27  ;;  %v2122_v39 = vcombine.high %v2112_v33, %v2112_v33  ;;  %v2129_v41 = vrot.slane %v2112_v33, %v2911_v23 }
0x2c19   :  { %2262 = vst.sshfl [vmem:[#allocation2] sm:$0x3 pattern:$0x76325410] %v2112_v33 }
0x2c1a   :  { %v2155_v42 = vcombine.high %v2153_v34, %v2153_v34  ;;  %2169 = vst [vmem:[#allocation2 + $0xa] sm:$0x3] %v2154_v36  ;;  %v2136_v43 = vrot.slane %v2122_v39, %v2911_v23  ;;  %v2137_v44 = vcombine.high %v2129_v41, %v2129_v41  ;;  %2263 = vst.sshfl [vmem:[#allocation2 + $0x4] sm:$0x3 pattern:$0x76325410] %v2122_v39 }
0x2c1c   :  { %2171 = vst [vmem:[#allocation2 + $0xe] sm:$0x3] %v2155_v42  ;;  %v2138_v45 = vcombine.high %v2136_v43, %v2136_v43  ;;  %2165 = vst [vmem:[#allocation2 + $0x2] sm:$0x3] %v2137_v44 }
0x2c1e   :  { %2167 = vst [vmem:[#allocation2 + $0x6] sm:$0x3] %v2138_v45 }
0x2c1f   :  { %2762 = shalt.err (!%p2759_p0)
}
0x2c20   :  { %2183 = dma.vmem_to_hbm [thread:$0]  %s2178_s13, 256, %s3342_s11, [#allocation3], %s2778_s24, %s2778_s24, %s2782_s5  }
0x2c21   :  { %2771 = dma.done.wait [#allocation3], 256  }
0x2c22   :  { %2772 = vsyncadd [#allocation3], 4294967040 }
0x2c23   :  { %2773 = dma.done.wait [#allocation5], 128  }
0x2c24   :  { %2774 = vsyncadd [#allocation5], 4294967168 }
0x2c25   :  { %2217 = vsyncpa [#allocation3], 1 }
0x2c26   :  { %2218 = vsyncpa [#allocation5], 1 }

</bundles_post_ra>
